<compile_context>
chip_gen: v6e
topology: v6e:2x2x1
jax: 0.10.0
libtpu: 0.0.40
codegen_flags: <defaults>
</compile_context>

<pallas_src>
import functools

import jax
import jax.numpy as jnp
from jax import lax
from jax.experimental import pallas as pl
from jax.experimental.pallas import tpu as pltpu

SLOPE = 0.01  # nn.LeakyReLU default negative_slope


def _leaky(x):
    return jnp.where(x >= 0, x, SLOPE * x)


def _round_up(x, m):
    return ((x + m - 1) // m) * m


def _vmem_capacity_bytes():
    try:
        cap = int(getattr(pltpu.get_tpu_info(), "vmem_capacity_bytes"))
        if cap > 0:
            return cap
    except Exception:
        pass
    return 64 << 20  # conservative fallback (v7x per-TensorCore VMEM)


# -----------------------------------------------------------------------------
# Fused NNConv stack + graph mean-pool kernel: grid = (num_layers, n_edge_tiles)
# Scalar prefetch: src ids [E_pad], tgt ids [E_pad], batch ids [N_pad] (SMEM).
# -----------------------------------------------------------------------------
def _conv_stack_kernel(*refs, conv_dims, c_pad, e_tile, n_real):
    num_layers = len(conv_dims) - 1
    src_ref, tgt_ref, batch_ref = refs[0], refs[1], refs[2]
    x0_ref, ea_ref, invdeg_ref, invcnt_ref = refs[3:7]
    layer_refs = refs[7:7 + 5 * num_layers]
    out_ref = refs[7 + 5 * num_layers]                 # pooled [B_pad, c_pad]
    x_cur, acc, xsrc, msgbuf = refs[8 + 5 * num_layers:]

    layer_id = pl.program_id(0)
    tile_id = pl.program_id(1)
    n_tiles = pl.num_programs(1)
    e_off = tile_id * e_tile

    # very first step: load padded input features, zero the pooled output
    @pl.when((layer_id == 0) & (tile_id == 0))
    def _init_first():
        x_cur[...] = x0_ref[...]
        out_ref[...] = jnp.zeros_like(out_ref)

    # per-layer init: zero the aggregation accumulator
    @pl.when(tile_id == 0)
    def _init_layer():
        acc[...] = jnp.zeros_like(acc)

    # --- gather x[src] rows for this edge tile (scalar-prefetched indices) ---
    def _gather(e, carry):
        s = src_ref[e_off + e]
        xsrc[pl.ds(e, 1), :] = x_cur[pl.ds(s, 1), :]
        return carry
    lax.fori_loop(0, e_tile, _gather, 0)

    ea = ea_ref[...]          # [te, F]
    x_src = xsrc[...]         # [te, c_pad]

    # --- per-layer edge MLP + per-edge messages (lane-dense, single MXU dot) --
    for li in range(num_layers):
        c_in = conv_dims[li]
        w1_ref, b1_ref, w2_ref, b2_ref, _ = layer_refs[5 * li:5 * li + 5]

        @pl.when(layer_id == li)
        def _message(c_in=c_in, w1_ref=w1_ref, b1_ref=b1_ref,
                     w2_ref=w2_ref, b2_ref=b2_ref):
            # edge MLP: Linear -> LeakyReLU -> Linear (c_out padded to 128 per
            # input-channel block so every slice below is lane-aligned)
            h = _leaky(jnp.dot(ea, w1_ref[...],
                               preferred_element_type=jnp.float32) + b1_ref[...])
            wf = jnp.dot(h, w2_ref[...],
                         preferred_element_type=jnp.float32) + b2_ref[...]
            msg = x_src[:, 0:1] * wf[:, 0:c_pad]
            for i in range(1, c_in):
                msg = msg + x_src[:, i:i + 1] * wf[:, i * c_pad:(i + 1) * c_pad]
            msgbuf[...] = msg

    # --- scatter-add messages onto target node rows -------------------------
    # TODO(synk): vectorized sorted-by-target segment accumulation instead of
    # the serial per-edge loop.
    def _scatter(e, carry):
        t = tgt_ref[e_off + e]
        acc[pl.ds(t, 1), :] = acc[pl.ds(t, 1), :] + msgbuf[pl.ds(e, 1), :]
        return carry
    lax.fori_loop(0, e_tile, _scatter, 0)

    # --- per-layer finalize: mean + bias + LeakyReLU; last layer also pools --
    for li in range(num_layers):
        bias_ref = layer_refs[5 * li + 4]

        @pl.when((layer_id == li) & (tile_id == n_tiles - 1))
        def _finalize(li=li, bias_ref=bias_ref):
            x_cur[...] = _leaky(acc[...] * invdeg_ref[...] + bias_ref[...])
            if li == num_layers - 1:
                # fold scatter_mean(x, batch) into the last layer's finalize
                def _pool(i, carry):
                    b = batch_ref[i]
                    out_ref[pl.ds(b, 1), :] = (out_ref[pl.ds(b, 1), :]
                                               + x_cur[pl.ds(i, 1), :])
                    return carry
                lax.fori_loop(0, n_real, _pool, 0)
                out_ref[...] = out_ref[...] * invcnt_ref[...]


def conv_stack_pool(x, edge_attr, src, tgt, batch, num_graphs,
                    conv_params, conv_size):
    n, c0 = x.shape
    e = int(src.shape[0])
    f = edge_attr.shape[1]
    conv_dims = [c0] + list(conv_size)
    num_layers = len(conv_size)
    c_pad = _round_up(max(conv_dims), 128)
    nn_inner = conv_params[0]['w1'].shape[1]
    nn_pad = _round_up(nn_inner, 128)
    n_pad = _round_up(n + 1, 8)          # +1 spare "trash" row for padded edges
    b_pad = _round_up(num_graphs, 8)

    vmem_cap = _vmem_capacity_bytes()
    te_max = 1024 if vmem_cap >= (96 << 20) else 512   # generation-aware tile
    if e <= te_max:
        te = max(_round_up(e, 8), 8)
        e_pad = te
    else:
        te = te_max
        e_pad = _round_up(e, te)
    n_tiles = e_pad // te

    # scalar-prefetch index arrays (padded edges point at the trash row n)
    src_pad = jnp.full((e_pad,), n, jnp.int32).at[:e].set(src.astype(jnp.int32))
    tgt_pad = jnp.full((e_pad,), n, jnp.int32).at[:e].set(tgt.astype(jnp.int32))
    batch_pad = jnp.zeros((n_pad,), jnp.int32).at[:n].set(batch.astype(jnp.int32))

    x0 = jnp.zeros((n_pad, c_pad), jnp.float32).at[:n, :c0].set(x)
    ea_pad = jnp.zeros((e_pad, f), jnp.float32).at[:e].set(edge_attr)

    deg = jnp.zeros((n_pad, 1), jnp.float32).at[tgt].add(1.0)
    inv_deg = 1.0 / jnp.maximum(deg, 1.0)
    cnt = jnp.zeros((b_pad, 1), jnp.float32).at[batch].add(1.0)
    inv_cnt = 1.0 / jnp.maximum(cnt, 1.0)

    def resident(shape):
        return pl.BlockSpec(shape, lambda *_: (0, 0))

    in_specs = [
        resident((n_pad, c_pad)),                             # x0
        pl.BlockSpec((te, f), lambda l, t, *_: (t, 0)),        # edge_attr tile
        resident((n_pad, 1)),                                  # inv_deg
        resident((b_pad, 1)),                                  # inv_cnt
    ]
    args = [x0, ea_pad, inv_deg, inv_cnt]

    for li in range(num_layers):
        p = conv_params[li]
        c_in, c_out = conv_dims[li], conv_dims[li + 1]
        w1p = jnp.zeros((f, nn_pad), jnp.float32).at[:, :nn_inner].set(p['w1'])
        b1p = jnp.zeros((1, nn_pad), jnp.float32).at[:, :nn_inner].set(p['b1'])
        # second edge-MLP Linear: per-input-channel c_out block padded to 128
        w2r = p['w2'].reshape(nn_inner, c_in, c_out)
        w2p = (jnp.zeros((nn_pad, c_in, c_pad), jnp.float32)
               .at[:nn_inner, :, :c_out].set(w2r)
               .reshape(nn_pad, c_in * c_pad))
        b2r = p['b2'].reshape(1, c_in, c_out)
        b2p = (jnp.zeros((1, c_in, c_pad), jnp.float32)
               .at[:, :, :c_out].set(b2r)
               .reshape(1, c_in * c_pad))
        biasp = jnp.zeros((1, c_pad), jnp.float32).at[:, :c_out].set(p['bias'])
        layer_args = [w1p, b1p, w2p, b2p, biasp]
        args += layer_args
        in_specs += [resident(a.shape) for a in layer_args]

    # accurate per-buffer VMEM estimate (resident weights + double-buffered edge
    # tile + scratch + in-flight per-tile intermediates), clamped to 75% of the
    # queried per-core VMEM capacity (v7x-safe).
    resident_bytes = sum(int(a.size) * 4 for a in args[0:1] + args[2:])
    streamed_bytes = 2 * te * f * 4
    scratch_bytes = (2 * n_pad * c_pad + 2 * te * c_pad) * 4
    interm_bytes = te * (nn_pad + max(conv_dims[:-1]) * c_pad + c_pad) * 4
    out_bytes = b_pad * c_pad * 4
    est = 2 * (resident_bytes + out_bytes) + streamed_bytes + scratch_bytes + interm_bytes
    vmem_limit = int(min(max(est + (8 << 20), 32 << 20), int(vmem_cap * 0.75)))

    kernel = functools.partial(_conv_stack_kernel, conv_dims=tuple(conv_dims),
                               c_pad=c_pad, e_tile=te, n_real=n)
    pooled = pl.pallas_call(
        kernel,
        out_shape=jax.ShapeDtypeStruct((b_pad, c_pad), jnp.float32),
        grid_spec=pltpu.PrefetchScalarGridSpec(
            num_scalar_prefetch=3,
            grid=(num_layers, n_tiles),
            in_specs=in_specs,
            out_specs=pl.BlockSpec((b_pad, c_pad), lambda l, t, *_: (0, 0)),
            scratch_shapes=[pltpu.VMEM((n_pad, c_pad), jnp.float32),   # x_cur
                            pltpu.VMEM((n_pad, c_pad), jnp.float32),   # acc
                            pltpu.VMEM((te, c_pad), jnp.float32),      # x[src]
                            pltpu.VMEM((te, c_pad), jnp.float32)]),    # msgs
        compiler_params=pltpu.CompilerParams(
            dimension_semantics=("arbitrary", "arbitrary"),
            vmem_limit_bytes=vmem_limit),
    )(src_pad, tgt_pad, batch_pad, *args)
    return pooled   # [b_pad, c_pad]; columns >= conv_size[-1] are zero


# -----------------------------------------------------------------------------
# Head kernel: Linear(cat([pooled, graph_ft])) + LeakyReLU chain.
# Mean-pooling already happened in the conv kernel; hidden dims 128-padded.
# -----------------------------------------------------------------------------
def _head_kernel(*refs, num_hidden):
    pooled_ref, gf_ref, w0a_ref, w0b_ref, b0_ref = refs[:5]
    lin_refs = refs[5:5 + 2 * num_hidden]
    out_ref = refs[-1]

    # Linear(cat([pooled, graph_ft])) == pooled @ W[:C] + graph_ft @ W[C:] + b
    z = _leaky(jnp.dot(pooled_ref[...], w0a_ref[...], preferred_element_type=jnp.float32)
               + jnp.dot(gf_ref[...], w0b_ref[...], preferred_element_type=jnp.float32)
               + b0_ref[...])
    for li in range(num_hidden):
        w_ref, b_ref = lin_refs[2 * li], lin_refs[2 * li + 1]
        z = _leaky(jnp.dot(z, w_ref[...],
                           preferred_element_type=jnp.float32) + b_ref[...])
    out_ref[...] = z


def head_layers(pooled_pad, graph_ft, head_params, hidden_size, num_graphs):
    b_pad, c_pad = pooled_pad.shape
    b, extra = graph_ft.shape
    num_hidden = len(hidden_size) - 1
    hpad = [_round_up(h, 128) for h in hidden_size]   # lane-dense hidden dims

    gf_pad = jnp.zeros((b_pad, extra), jnp.float32).at[:b].set(graph_ft)

    def pad2(w, r, c):
        return jnp.zeros((r, c), jnp.float32).at[:w.shape[0], :w.shape[1]].set(w)

    args = [pooled_pad, gf_pad,
            pad2(head_params['w0a'], c_pad, hpad[0]),
            pad2(head_params['w0b'], extra, hpad[0]),
            pad2(head_params['b0'], 1, hpad[0])]
    for li in range(num_hidden):
        args.append(pad2(head_params['ws'][li], hpad[li], hpad[li + 1]))
        args.append(pad2(head_params['bs'][li], 1, hpad[li + 1]))

    vmem_cap = _vmem_capacity_bytes()
    est = 2 * sum(int(a.size) * 4 for a in args) + 2 * b_pad * hpad[-1] * 4
    vmem_limit = int(min(max(est + (4 << 20), 16 << 20), int(vmem_cap * 0.75)))

    out = pl.pallas_call(
        functools.partial(_head_kernel, num_hidden=num_hidden),
        out_shape=jax.ShapeDtypeStruct((b_pad, hpad[-1]), jnp.float32),
        in_specs=[pl.BlockSpec(memory_space=pltpu.MemorySpace.VMEM)] * len(args),
        out_specs=pl.BlockSpec(memory_space=pltpu.MemorySpace.VMEM),
        compiler_params=pltpu.CompilerParams(vmem_limit_bytes=vmem_limit),
    )(*args)
    return out[:num_graphs, :hidden_size[-1]]   # strip row/lane padding


# -----------------------------------------------------------------------------
# Full ENN forward (Pallas) and pure-JAX reference
# -----------------------------------------------------------------------------
def enn_forward(params, x, edge_index, edge_attr, graph_ft, batch,
                conv_size, hidden_size):
    src, tgt = edge_index[0], edge_index[1]
    num_graphs = graph_ft.shape[0]
    # BatchNorm1d layers from __init__ are intentionally not applied (the
    # original forward's repr dispatch skips them).
    pooled = conv_stack_pool(x, edge_attr, src, tgt, batch, num_graphs,
                             params['convs'], conv_size)
    return head_layers(pooled, graph_ft, params['head'], hidden_size, num_graphs)


def enn_reference(params, x, edge_index, edge_attr, graph_ft, batch,
                  conv_size, hidden_size):
    n = x.shape[0]
    b = graph_ft.shape[0]
    src, tgt = edge_index[0], edge_index[1]
    h = x
    for li, c_out in enumerate(conv_size):
        p = params['convs'][li]
        c_in = h.shape[1]
        eh = _leaky(edge_attr @ p['w1'] + p['b1'])
        w_e = (eh @ p['w2'] + p['b2']).reshape(-1, c_in, c_out)
        msg = jnp.einsum('ei,eio->eo', h[src], w_e)
        agg = jnp.zeros((n, c_out), jnp.float32).at[tgt].add(msg)
        deg = jnp.zeros((n, 1), jnp.float32).at[tgt].add(1.0)
        h = _leaky(agg / jnp.maximum(deg, 1.0) + p['bias'])
    cnt = jnp.zeros((b, 1), jnp.float32).at[batch].add(1.0)
    pooled = jnp.zeros((b, h.shape[1]), jnp.float32).at[batch].add(h)
    pooled = pooled / jnp.maximum(cnt, 1.0)
    z = jnp.concatenate([pooled, graph_ft], axis=1)
    hp = params['head']
    w0 = jnp.concatenate([hp['w0a'], hp['w0b']], axis=0)
    z = _leaky(z @ w0 + hp['b0'])
    for l in range(len(hidden_size) - 1):
        z = _leaky(z @ hp['ws'][l] + hp['bs'][l])
    return z


def init_params(key, inp, num_ft, extra_inp, conv_size, hidden_size):
    nn_inner = 2 ** num_ft
    state = {'k': key}

    def nxt():
        state['k'], sub = jax.random.split(state['k'])
        return sub

    params = {'convs': [], 'head': {}}
    dims = [inp] + list(conv_size)
    for i in range(len(conv_size)):
        c_in, c_out = dims[i], dims[i + 1]
        params['convs'].append({
            'w1': 0.2 * jax.random.normal(nxt(), (num_ft, nn_inner), jnp.float32),
            'b1': 0.1 * jax.random.normal(nxt(), (1, nn_inner), jnp.float32),
            'w2': 0.2 * jax.random.normal(nxt(), (nn_inner, c_in * c_out), jnp.float32),
            'b2': 0.1 * jax.random.normal(nxt(), (1, c_in * c_out), jnp.float32),
            'bias': 0.1 * jax.random.normal(nxt(), (1, c_out), jnp.float32),
        })
    c_last = conv_size[-1]
    params['head']['w0a'] = 0.2 * jax.random.normal(nxt(), (c_last, hidden_size[0]), jnp.float32)
    params['head']['w0b'] = 0.2 * jax.random.normal(nxt(), (extra_inp, hidden_size[0]), jnp.float32)
    params['head']['b0'] = 0.1 * jax.random.normal(nxt(), (1, hidden_size[0]), jnp.float32)
    ws, bs = [], []
    for i in range(len(hidden_size) - 1):
        ws.append(0.2 * jax.random.normal(nxt(), (hidden_size[i], hidden_size[i + 1]), jnp.float32))
        bs.append(0.1 * jax.random.normal(nxt(), (1, hidden_size[i + 1]), jnp.float32))
    params['head']['ws'] = ws
    params['head']['bs'] = bs
    return params


if __name__ == "__main__":
    # module config (small)
    inp, num_ft, extra_inp = 4, 3, 5
    conv_size = [8, 16]
    hidden_size = [32, 16]

    key = jax.random.PRNGKey(0)
    kp, kx, ke, kg = jax.random.split(key, 4)
    params = init_params(kp, inp, num_ft, extra_inp, conv_size, hidden_size)

    # synthetic graph batch: 2 graphs of 4 nodes, ring-ish edges (every node
    # has 2 incoming edges)
    num_graphs, nodes_per_graph = 2, 4
    N = num_graphs * nodes_per_graph
    src_list, tgt_list = [], []
    for g in range(num_graphs):
        base = g * nodes_per_graph
        for i in range(nodes_per_graph):
            for d in (1, 2):
                src_list.append(base + i)
                tgt_list.append(base + (i + d) % nodes_per_graph)
    edge_index = jnp.array([src_list, tgt_list], dtype=jnp.int32)   # [2, E]
    E = edge_index.shape[1]

    x = jax.random.normal(kx, (N, inp), jnp.float32)
    edge_attr = jax.random.normal(ke, (E, num_ft), jnp.float32)
    graph_ft = jax.random.normal(kg, (num_graphs, extra_inp), jnp.float32)
    batch = jnp.repeat(jnp.arange(num_graphs, dtype=jnp.int32), nodes_per_graph)

    out = enn_forward(params, x, edge_index, edge_attr, graph_ft, batch,
                      conv_size, hidden_size)
    out = jax.block_until_ready(out)

    ref = enn_reference(params, x, edge_index, edge_attr, graph_ft, batch,
                        conv_size, hidden_size)
    assert out.shape == (num_graphs, hidden_size[-1])
    assert jnp.allclose(out, ref, rtol=1e-4, atol=1e-4), (out, ref)
    print("KERNEL_OK")
</pallas_src>

<mosaic_0001>
module attributes {stable_mosaic.version = 11 : i64} {
  func.func @_conv_stack_kernel(%arg0: i32, %arg1: i32, %arg2: memref<16xi32, #tpu.memory_space<smem>>, %arg3: memref<16xi32, #tpu.memory_space<smem>>, %arg4: memref<16xi32, #tpu.memory_space<smem>>, %arg5: memref<16x128xf32, #tpu.memory_space<vmem>>, %arg6: memref<16x3xf32, #tpu.memory_space<vmem>>, %arg7: memref<16x1xf32, #tpu.memory_space<vmem>>, %arg8: memref<8x1xf32, #tpu.memory_space<vmem>>, %arg9: memref<3x128xf32, #tpu.memory_space<vmem>>, %arg10: memref<1x128xf32, #tpu.memory_space<vmem>>, %arg11: memref<128x512xf32, #tpu.memory_space<vmem>>, %arg12: memref<1x512xf32, #tpu.memory_space<vmem>>, %arg13: memref<1x128xf32, #tpu.memory_space<vmem>>, %arg14: memref<3x128xf32, #tpu.memory_space<vmem>>, %arg15: memref<1x128xf32, #tpu.memory_space<vmem>>, %arg16: memref<128x1024xf32, #tpu.memory_space<vmem>>, %arg17: memref<1x1024xf32, #tpu.memory_space<vmem>>, %arg18: memref<1x128xf32, #tpu.memory_space<vmem>>, %arg19: memref<8x128xf32, #tpu.memory_space<vmem>>, %arg20: memref<16x128xf32, #tpu.memory_space<vmem>>, %arg21: memref<16x128xf32, #tpu.memory_space<vmem>>, %arg22: memref<16x128xf32, #tpu.memory_space<vmem>>, %arg23: memref<16x128xf32, #tpu.memory_space<vmem>>) attributes {dimension_semantics = [#tpu.dimension_semantics<arbitrary>, #tpu.dimension_semantics<arbitrary>], iteration_bounds = array<i64: 2, 1>, scalar_prefetch = 3 : i64, scratch_operands = 4 : i64, tpu.core_type = #tpu.core_type<tc>, window_params = [{pipeline_mode = #tpu.pipeline_mode<synchronous>, transform_indices = @transform_0, window_bounds = array<i64: 16, 128>}, {transform_indices = @transform_1, window_bounds = array<i64: 16, 3>}, {pipeline_mode = #tpu.pipeline_mode<synchronous>, transform_indices = @transform_2, window_bounds = array<i64: 16, 1>}, {pipeline_mode = #tpu.pipeline_mode<synchronous>, transform_indices = @transform_3, window_bounds = array<i64: 8, 1>}, {pipeline_mode = #tpu.pipeline_mode<synchronous>, transform_indices = @transform_4, window_bounds = array<i64: 3, 128>}, {pipeline_mode = #tpu.pipeline_mode<synchronous>, transform_indices = @transform_5, window_bounds = array<i64: 1, 128>}, {pipeline_mode = #tpu.pipeline_mode<synchronous>, transform_indices = @transform_6, window_bounds = array<i64: 128, 512>}, {pipeline_mode = #tpu.pipeline_mode<synchronous>, transform_indices = @transform_7, window_bounds = array<i64: 1, 512>}, {pipeline_mode = #tpu.pipeline_mode<synchronous>, transform_indices = @transform_8, window_bounds = array<i64: 1, 128>}, {pipeline_mode = #tpu.pipeline_mode<synchronous>, transform_indices = @transform_9, window_bounds = array<i64: 3, 128>}, {pipeline_mode = #tpu.pipeline_mode<synchronous>, transform_indices = @transform_10, window_bounds = array<i64: 1, 128>}, {pipeline_mode = #tpu.pipeline_mode<synchronous>, transform_indices = @transform_11, window_bounds = array<i64: 128, 1024>}, {pipeline_mode = #tpu.pipeline_mode<synchronous>, transform_indices = @transform_12, window_bounds = array<i64: 1, 1024>}, {pipeline_mode = #tpu.pipeline_mode<synchronous>, transform_indices = @transform_13, window_bounds = array<i64: 1, 128>}, {pipeline_mode = #tpu.pipeline_mode<synchronous>, transform_indices = @transform_14, window_bounds = array<i64: 8, 128>}]} {
    %c16_i32 = arith.constant 16 : i32
    %0 = arith.muli %arg1, %c16_i32 : i32
    %c0_i32 = arith.constant 0 : i32
    %1 = arith.cmpi eq, %arg0, %c0_i32 : i32
    %c0_i32_0 = arith.constant 0 : i32
    %2 = arith.cmpi eq, %arg1, %c0_i32_0 : i32
    %3 = arith.andi %1, %2 : i1
    %4 = arith.extui %3 : i1 to i32
    %c0_i32_1 = arith.constant 0 : i32
    %5 = arith.cmpi ne, %4, %c0_i32_1 : i32
    scf.if %5 {
      %c0_24 = arith.constant 0 : index
      %c0_25 = arith.constant 0 : index
      %29 = vector.load %arg5[%c0_24, %c0_25] : memref<16x128xf32, #tpu.memory_space<vmem>>, vector<16x128xf32>
      %c0_26 = arith.constant 0 : index
      %c0_27 = arith.constant 0 : index
      %30 = vector.load %arg20[%c0_26, %c0_27] : memref<16x128xf32, #tpu.memory_space<vmem>>, vector<16x128xf32>
      tpu.vector_store %arg20[%c0_26, %c0_27], %29 {strides = array<i32>} : memref<16x128xf32, #tpu.memory_space<vmem>>, vector<16x128xf32>,
      %cst = arith.constant 0.000000e+00 : f32
      %31 = vector.broadcast %cst : f32 to vector<8x128xf32>
      %c0_28 = arith.constant 0 : index
      %c0_29 = arith.constant 0 : index
      %32 = vector.load %arg19[%c0_28, %c0_29] : memref<8x128xf32, #tpu.memory_space<vmem>>, vector<8x128xf32>
      tpu.vector_store %arg19[%c0_28, %c0_29], %31 {strides = array<i32>} : memref<8x128xf32, #tpu.memory_space<vmem>>, vector<8x128xf32>,
    } else {
    }
    %c0_i32_2 = arith.constant 0 : i32
    %6 = arith.cmpi eq, %arg1, %c0_i32_2 : i32
    %7 = arith.extui %6 : i1 to i32
    %c0_i32_3 = arith.constant 0 : i32
    %8 = arith.cmpi ne, %7, %c0_i32_3 : i32
    scf.if %8 {
      %cst = arith.constant 0.000000e+00 : f32
      %29 = vector.broadcast %cst : f32 to vector<16x128xf32>
      %c0_24 = arith.constant 0 : index
      %c0_25 = arith.constant 0 : index
      %30 = vector.load %arg21[%c0_24, %c0_25] : memref<16x128xf32, #tpu.memory_space<vmem>>, vector<16x128xf32>
      tpu.vector_store %arg21[%c0_24, %c0_25], %29 {strides = array<i32>} : memref<16x128xf32, #tpu.memory_space<vmem>>, vector<16x128xf32>,
    } else {
    }
    %c0_i32_4 = arith.constant 0 : i32
    %c16_i32_5 = arith.constant 16 : i32
    %9 = arith.addi %c0_i32_4, %c16_i32_5 : i32
    %c1_i32 = arith.constant 1 : i32
    scf.for %arg24 = %c0_i32_4 to %9 step %c1_i32  : i32 {
      %29 = arith.addi %0, %arg24 : i32
      %30 = arith.index_cast %29 : i32 to index
      %31 = memref.load %arg2[%30] : memref<16xi32, #tpu.memory_space<smem>>
      %32 = arith.index_cast %31 : i32 to index
      %c0_24 = arith.constant 0 : index
      %33 = vector.load %arg20[%32, %c0_24] : memref<16x128xf32, #tpu.memory_space<vmem>>, vector<1x128xf32>
      %34 = arith.index_cast %arg24 : i32 to index
      %c0_25 = arith.constant 0 : index
      %35 = vector.load %arg22[%34, %c0_25] : memref<16x128xf32, #tpu.memory_space<vmem>>, vector<1x128xf32>
      tpu.vector_store %arg22[%34, %c0_25], %33 {strides = array<i32>} : memref<16x128xf32, #tpu.memory_space<vmem>>, vector<1x128xf32>,
    }
    %c16_i32_6 = arith.constant 16 : i32
    %c0 = arith.constant 0 : index
    %c0_7 = arith.constant 0 : index
    %10 = vector.load %arg6[%c0, %c0_7] : memref<16x3xf32, #tpu.memory_space<vmem>>, vector<16x3xf32>
    %c0_8 = arith.constant 0 : index
    %c0_9 = arith.constant 0 : index
    %11 = vector.load %arg22[%c0_8, %c0_9] : memref<16x128xf32, #tpu.memory_space<vmem>>, vector<16x128xf32>
    %c0_i32_10 = arith.constant 0 : i32
    %12 = arith.cmpi eq, %arg0, %c0_i32_10 : i32
    %13 = arith.extui %12 : i1 to i32
    %c0_i32_11 = arith.constant 0 : i32
    %14 = arith.cmpi ne, %13, %c0_i32_11 : i32
    scf.if %14 {
      %c0_24 = arith.constant 0 : index
      %c0_25 = arith.constant 0 : index
      %29 = vector.load %arg9[%c0_24, %c0_25] : memref<3x128xf32, #tpu.memory_space<vmem>>, vector<3x128xf32>
      %cst = arith.constant dense<0.000000e+00> : vector<16x128xf32>
      %30 = tpu.matmul %10, %29, %cst {dimension_numbers = #tpu.dot_dimension_numbers<[1], [0], [0], [1], [0, 0, 1, 1], [], []>} : vector<16x3xf32>, vector<3x128xf32>, vector<16x128xf32> -> vector<16x128xf32>
      %c0_26 = arith.constant 0 : index
      %c0_27 = arith.constant 0 : index
      %31 = vector.load %arg10[%c0_26, %c0_27] : memref<1x128xf32, #tpu.memory_space<vmem>>, vector<1x128xf32>
      %32 = vector.broadcast %31 : vector<1x128xf32> to vector<16x128xf32>
      %33 = arith.addf %30, %32 : vector<16x128xf32>
      %cst_28 = arith.constant 0.000000e+00 : f32
      %34 = vector.broadcast %cst_28 : f32 to vector<16x128xf32>
      %35 = arith.cmpf oge, %33, %34 : vector<16x128xf32>
      %cst_29 = arith.constant 0.00999999977 : f32
      %36 = vector.broadcast %cst_29 : f32 to vector<16x128xf32>
      %37 = arith.mulf %36, %33 : vector<16x128xf32>
      %38 = arith.select %35, %33, %37 : vector<16x128xi1>, vector<16x128xf32>
      %c0_30 = arith.constant 0 : index
      %c0_31 = arith.constant 0 : index
      %39 = vector.load %arg11[%c0_30, %c0_31] : memref<128x512xf32, #tpu.memory_space<vmem>>, vector<128x512xf32>
      %cst_32 = arith.constant dense<0.000000e+00> : vector<16x512xf32>
      %40 = tpu.matmul %38, %39, %cst_32 {dimension_numbers = #tpu.dot_dimension_numbers<[1], [0], [0], [1], [0, 0, 1, 1], [], []>} : vector<16x128xf32>, vector<128x512xf32>, vector<16x512xf32> -> vector<16x512xf32>
      %c0_33 = arith.constant 0 : index
      %c0_34 = arith.constant 0 : index
      %41 = vector.load %arg12[%c0_33, %c0_34] : memref<1x512xf32, #tpu.memory_space<vmem>>, vector<1x512xf32>
      %42 = vector.broadcast %41 : vector<1x512xf32> to vector<16x512xf32>
      %43 = arith.addf %40, %42 : vector<16x512xf32>
      %44 = vector.extract_strided_slice %11 {offsets = [0, 0], sizes = [16, 1], strides = [1, 1]} : vector<16x128xf32> to vector<16x1xf32>
      %45 = vector.extract_strided_slice %43 {offsets = [0, 0], sizes = [16, 128], strides = [1, 1]} : vector<16x512xf32> to vector<16x128xf32>
      %46 = vector.broadcast %44 : vector<16x1xf32> to vector<16x128xf32>
      %47 = arith.mulf %46, %45 : vector<16x128xf32>
      %48 = vector.extract_strided_slice %11 {offsets = [0, 1], sizes = [16, 1], strides = [1, 1]} : vector<16x128xf32> to vector<16x1xf32>
      %49 = vector.extract_strided_slice %43 {offsets = [0, 128], sizes = [16, 128], strides = [1, 1]} : vector<16x512xf32> to vector<16x128xf32>
      %50 = vector.broadcast %48 : vector<16x1xf32> to vector<16x128xf32>
      %51 = arith.mulf %50, %49 : vector<16x128xf32>
      %52 = arith.addf %47, %51 : vector<16x128xf32>
      %53 = vector.extract_strided_slice %11 {offsets = [0, 2], sizes = [16, 1], strides = [1, 1]} : vector<16x128xf32> to vector<16x1xf32>
      %54 = vector.extract_strided_slice %43 {offsets = [0, 256], sizes = [16, 128], strides = [1, 1]} : vector<16x512xf32> to vector<16x128xf32>
      %55 = vector.broadcast %53 : vector<16x1xf32> to vector<16x128xf32>
      %56 = arith.mulf %55, %54 : vector<16x128xf32>
      %57 = arith.addf %52, %56 : vector<16x128xf32>
      %58 = vector.extract_strided_slice %11 {offsets = [0, 3], sizes = [16, 1], strides = [1, 1]} : vector<16x128xf32> to vector<16x1xf32>
      %59 = vector.extract_strided_slice %43 {offsets = [0, 384], sizes = [16, 128], strides = [1, 1]} : vector<16x512xf32> to vector<16x128xf32>
      %60 = vector.broadcast %58 : vector<16x1xf32> to vector<16x128xf32>
      %61 = arith.mulf %60, %59 : vector<16x128xf32>
      %62 = arith.addf %57, %61 : vector<16x128xf32>
      %c0_35 = arith.constant 0 : index
      %c0_36 = arith.constant 0 : index
      %63 = vector.load %arg23[%c0_35, %c0_36] : memref<16x128xf32, #tpu.memory_space<vmem>>, vector<16x128xf32>
      tpu.vector_store %arg23[%c0_35, %c0_36], %62 {strides = array<i32>} : memref<16x128xf32, #tpu.memory_space<vmem>>, vector<16x128xf32>,
    } else {
    }
    %c1_i32_12 = arith.constant 1 : i32
    %15 = arith.cmpi eq, %arg0, %c1_i32_12 : i32
    %16 = arith.extui %15 : i1 to i32
    %c0_i32_13 = arith.constant 0 : i32
    %17 = arith.cmpi ne, %16, %c0_i32_13 : i32
    scf.if %17 {
      %c0_24 = arith.constant 0 : index
      %c0_25 = arith.constant 0 : index
      %29 = vector.load %arg14[%c0_24, %c0_25] : memref<3x128xf32, #tpu.memory_space<vmem>>, vector<3x128xf32>
      %cst = arith.constant dense<0.000000e+00> : vector<16x128xf32>
      %30 = tpu.matmul %10, %29, %cst {dimension_numbers = #tpu.dot_dimension_numbers<[1], [0], [0], [1], [0, 0, 1, 1], [], []>} : vector<16x3xf32>, vector<3x128xf32>, vector<16x128xf32> -> vector<16x128xf32>
      %c0_26 = arith.constant 0 : index
      %c0_27 = arith.constant 0 : index
      %31 = vector.load %arg15[%c0_26, %c0_27] : memref<1x128xf32, #tpu.memory_space<vmem>>, vector<1x128xf32>
      %32 = vector.broadcast %31 : vector<1x128xf32> to vector<16x128xf32>
      %33 = arith.addf %30, %32 : vector<16x128xf32>
      %cst_28 = arith.constant 0.000000e+00 : f32
      %34 = vector.broadcast %cst_28 : f32 to vector<16x128xf32>
      %35 = arith.cmpf oge, %33, %34 : vector<16x128xf32>
      %cst_29 = arith.constant 0.00999999977 : f32
      %36 = vector.broadcast %cst_29 : f32 to vector<16x128xf32>
      %37 = arith.mulf %36, %33 : vector<16x128xf32>
      %38 = arith.select %35, %33, %37 : vector<16x128xi1>, vector<16x128xf32>
      %c0_30 = arith.constant 0 : index
      %c0_31 = arith.constant 0 : index
      %39 = vector.load %arg16[%c0_30, %c0_31] : memref<128x1024xf32, #tpu.memory_space<vmem>>, vector<128x1024xf32>
      %cst_32 = arith.constant dense<0.000000e+00> : vector<16x1024xf32>
      %40 = tpu.matmul %38, %39, %cst_32 {dimension_numbers = #tpu.dot_dimension_numbers<[1], [0], [0], [1], [0, 0, 1, 1], [], []>} : vector<16x128xf32>, vector<128x1024xf32>, vector<16x1024xf32> -> vector<16x1024xf32>
      %c0_33 = arith.constant 0 : index
      %c0_34 = arith.constant 0 : index
      %41 = vector.load %arg17[%c0_33, %c0_34] : memref<1x1024xf32, #tpu.memory_space<vmem>>, vector<1x1024xf32>
      %42 = vector.broadcast %41 : vector<1x1024xf32> to vector<16x1024xf32>
      %43 = arith.addf %40, %42 : vector<16x1024xf32>
      %44 = vector.extract_strided_slice %11 {offsets = [0, 0], sizes = [16, 1], strides = [1, 1]} : vector<16x128xf32> to vector<16x1xf32>
      %45 = vector.extract_strided_slice %43 {offsets = [0, 0], sizes = [16, 128], strides = [1, 1]} : vector<16x1024xf32> to vector<16x128xf32>
      %46 = vector.broadcast %44 : vector<16x1xf32> to vector<16x128xf32>
      %47 = arith.mulf %46, %45 : vector<16x128xf32>
      %48 = vector.extract_strided_slice %11 {offsets = [0, 1], sizes = [16, 1], strides = [1, 1]} : vector<16x128xf32> to vector<16x1xf32>
      %49 = vector.extract_strided_slice %43 {offsets = [0, 128], sizes = [16, 128], strides = [1, 1]} : vector<16x1024xf32> to vector<16x128xf32>
      %50 = vector.broadcast %48 : vector<16x1xf32> to vector<16x128xf32>
      %51 = arith.mulf %50, %49 : vector<16x128xf32>
      %52 = arith.addf %47, %51 : vector<16x128xf32>
      %53 = vector.extract_strided_slice %11 {offsets = [0, 2], sizes = [16, 1], strides = [1, 1]} : vector<16x128xf32> to vector<16x1xf32>
      %54 = vector.extract_strided_slice %43 {offsets = [0, 256], sizes = [16, 128], strides = [1, 1]} : vector<16x1024xf32> to vector<16x128xf32>
      %55 = vector.broadcast %53 : vector<16x1xf32> to vector<16x128xf32>
      %56 = arith.mulf %55, %54 : vector<16x128xf32>
      %57 = arith.addf %52, %56 : vector<16x128xf32>
      %58 = vector.extract_strided_slice %11 {offsets = [0, 3], sizes = [16, 1], strides = [1, 1]} : vector<16x128xf32> to vector<16x1xf32>
      %59 = vector.extract_strided_slice %43 {offsets = [0, 384], sizes = [16, 128], strides = [1, 1]} : vector<16x1024xf32> to vector<16x128xf32>
      %60 = vector.broadcast %58 : vector<16x1xf32> to vector<16x128xf32>
      %61 = arith.mulf %60, %59 : vector<16x128xf32>
      %62 = arith.addf %57, %61 : vector<16x128xf32>
      %63 = vector.extract_strided_slice %11 {offsets = [0, 4], sizes = [16, 1], strides = [1, 1]} : vector<16x128xf32> to vector<16x1xf32>
      %64 = vector.extract_strided_slice %43 {offsets = [0, 512], sizes = [16, 128], strides = [1, 1]} : vector<16x1024xf32> to vector<16x128xf32>
      %65 = vector.broadcast %63 : vector<16x1xf32> to vector<16x128xf32>
      %66 = arith.mulf %65, %64 : vector<16x128xf32>
      %67 = arith.addf %62, %66 : vector<16x128xf32>
      %68 = vector.extract_strided_slice %11 {offsets = [0, 5], sizes = [16, 1], strides = [1, 1]} : vector<16x128xf32> to vector<16x1xf32>
      %69 = vector.extract_strided_slice %43 {offsets = [0, 640], sizes = [16, 128], strides = [1, 1]} : vector<16x1024xf32> to vector<16x128xf32>
      %70 = vector.broadcast %68 : vector<16x1xf32> to vector<16x128xf32>
      %71 = arith.mulf %70, %69 : vector<16x128xf32>
      %72 = arith.addf %67, %71 : vector<16x128xf32>
      %73 = vector.extract_strided_slice %11 {offsets = [0, 6], sizes = [16, 1], strides = [1, 1]} : vector<16x128xf32> to vector<16x1xf32>
      %74 = vector.extract_strided_slice %43 {offsets = [0, 768], sizes = [16, 128], strides = [1, 1]} : vector<16x1024xf32> to vector<16x128xf32>
      %75 = vector.broadcast %73 : vector<16x1xf32> to vector<16x128xf32>
      %76 = arith.mulf %75, %74 : vector<16x128xf32>
      %77 = arith.addf %72, %76 : vector<16x128xf32>
      %78 = vector.extract_strided_slice %11 {offsets = [0, 7], sizes = [16, 1], strides = [1, 1]} : vector<16x128xf32> to vector<16x1xf32>
      %79 = vector.extract_strided_slice %43 {offsets = [0, 896], sizes = [16, 128], strides = [1, 1]} : vector<16x1024xf32> to vector<16x128xf32>
      %80 = vector.broadcast %78 : vector<16x1xf32> to vector<16x128xf32>
      %81 = arith.mulf %80, %79 : vector<16x128xf32>
      %82 = arith.addf %77, %81 : vector<16x128xf32>
      %c0_35 = arith.constant 0 : index
      %c0_36 = arith.constant 0 : index
      %83 = vector.load %arg23[%c0_35, %c0_36] : memref<16x128xf32, #tpu.memory_space<vmem>>, vector<16x128xf32>
      tpu.vector_store %arg23[%c0_35, %c0_36], %82 {strides = array<i32>} : memref<16x128xf32, #tpu.memory_space<vmem>>, vector<16x128xf32>,
    } else {
    }
    %c0_i32_14 = arith.constant 0 : i32
    %c16_i32_15 = arith.constant 16 : i32
    %18 = arith.addi %c0_i32_14, %c16_i32_15 : i32
    %c1_i32_16 = arith.constant 1 : i32
    scf.for %arg24 = %c0_i32_14 to %18 step %c1_i32_16  : i32 {
      %29 = arith.addi %0, %arg24 : i32
      %30 = arith.index_cast %29 : i32 to index
      %31 = memref.load %arg3[%30] : memref<16xi32, #tpu.memory_space<smem>>
      %32 = arith.index_cast %31 : i32 to index
      %c0_24 = arith.constant 0 : index
      %33 = vector.load %arg21[%32, %c0_24] : memref<16x128xf32, #tpu.memory_space<vmem>>, vector<1x128xf32>
      %34 = arith.index_cast %arg24 : i32 to index
      %c0_25 = arith.constant 0 : index
      %35 = vector.load %arg23[%34, %c0_25] : memref<16x128xf32, #tpu.memory_space<vmem>>, vector<1x128xf32>
      %36 = arith.addf %33, %35 : vector<1x128xf32>
      %37 = arith.index_cast %31 : i32 to index
      %c0_26 = arith.constant 0 : index
      %38 = vector.load %arg21[%37, %c0_26] : memref<16x128xf32, #tpu.memory_space<vmem>>, vector<1x128xf32>
      tpu.vector_store %arg21[%37, %c0_26], %36 {strides = array<i32>} : memref<16x128xf32, #tpu.memory_space<vmem>>, vector<1x128xf32>,
    }
    %c16_i32_17 = arith.constant 16 : i32
    %c0_i32_18 = arith.constant 0 : i32
    %19 = arith.cmpi eq, %arg0, %c0_i32_18 : i32
    %c0_i32_19 = arith.constant 0 : i32
    %20 = arith.cmpi eq, %arg1, %c0_i32_19 : i32
    %21 = arith.andi %19, %20 : i1
    %22 = arith.extui %21 : i1 to i32
    %c0_i32_20 = arith.constant 0 : i32
    %23 = arith.cmpi ne, %22, %c0_i32_20 : i32
    scf.if %23 {
      %c0_24 = arith.constant 0 : index
      %c0_25 = arith.constant 0 : index
      %29 = vector.load %arg21[%c0_24, %c0_25] : memref<16x128xf32, #tpu.memory_space<vmem>>, vector<16x128xf32>
      %c0_26 = arith.constant 0 : index
      %c0_27 = arith.constant 0 : index
      %30 = vector.load %arg7[%c0_26, %c0_27] : memref<16x1xf32, #tpu.memory_space<vmem>>, vector<16x1xf32>
      %31 = vector.broadcast %30 : vector<16x1xf32> to vector<16x128xf32>
      %32 = arith.mulf %29, %31 : vector<16x128xf32>
      %c0_28 = arith.constant 0 : index
      %c0_29 = arith.constant 0 : index
      %33 = vector.load %arg13[%c0_28, %c0_29] : memref<1x128xf32, #tpu.memory_space<vmem>>, vector<1x128xf32>
      %34 = vector.broadcast %33 : vector<1x128xf32> to vector<16x128xf32>
      %35 = arith.addf %32, %34 : vector<16x128xf32>
      %cst = arith.constant 0.000000e+00 : f32
      %36 = vector.broadcast %cst : f32 to vector<16x128xf32>
      %37 = arith.cmpf oge, %35, %36 : vector<16x128xf32>
      %cst_30 = arith.constant 0.00999999977 : f32
      %38 = vector.broadcast %cst_30 : f32 to vector<16x128xf32>
      %39 = arith.mulf %38, %35 : vector<16x128xf32>
      %40 = arith.select %37, %35, %39 : vector<16x128xi1>, vector<16x128xf32>
      %c0_31 = arith.constant 0 : index
      %c0_32 = arith.constant 0 : index
      %41 = vector.load %arg20[%c0_31, %c0_32] : memref<16x128xf32, #tpu.memory_space<vmem>>, vector<16x128xf32>
      tpu.vector_store %arg20[%c0_31, %c0_32], %40 {strides = array<i32>} : memref<16x128xf32, #tpu.memory_space<vmem>>, vector<16x128xf32>,
    } else {
    }
    %c1_i32_21 = arith.constant 1 : i32
    %24 = arith.cmpi eq, %arg0, %c1_i32_21 : i32
    %c0_i32_22 = arith.constant 0 : i32
    %25 = arith.cmpi eq, %arg1, %c0_i32_22 : i32
    %26 = arith.andi %24, %25 : i1
    %27 = arith.extui %26 : i1 to i32
    %c0_i32_23 = arith.constant 0 : i32
    %28 = arith.cmpi ne, %27, %c0_i32_23 : i32
    scf.if %28 {
      %c0_24 = arith.constant 0 : index
      %c0_25 = arith.constant 0 : index
      %29 = vector.load %arg21[%c0_24, %c0_25] : memref<16x128xf32, #tpu.memory_space<vmem>>, vector<16x128xf32>
      %c0_26 = arith.constant 0 : index
      %c0_27 = arith.constant 0 : index
      %30 = vector.load %arg7[%c0_26, %c0_27] : memref<16x1xf32, #tpu.memory_space<vmem>>, vector<16x1xf32>
      %31 = vector.broadcast %30 : vector<16x1xf32> to vector<16x128xf32>
      %32 = arith.mulf %29, %31 : vector<16x128xf32>
      %c0_28 = arith.constant 0 : index
      %c0_29 = arith.constant 0 : index
      %33 = vector.load %arg18[%c0_28, %c0_29] : memref<1x128xf32, #tpu.memory_space<vmem>>, vector<1x128xf32>
      %34 = vector.broadcast %33 : vector<1x128xf32> to vector<16x128xf32>
      %35 = arith.addf %32, %34 : vector<16x128xf32>
      %cst = arith.constant 0.000000e+00 : f32
      %36 = vector.broadcast %cst : f32 to vector<16x128xf32>
      %37 = arith.cmpf oge, %35, %36 : vector<16x128xf32>
      %cst_30 = arith.constant 0.00999999977 : f32
      %38 = vector.broadcast %cst_30 : f32 to vector<16x128xf32>
      %39 = arith.mulf %38, %35 : vector<16x128xf32>
      %40 = arith.select %37, %35, %39 : vector<16x128xi1>, vector<16x128xf32>
      %c0_31 = arith.constant 0 : index
      %c0_32 = arith.constant 0 : index
      %41 = vector.load %arg20[%c0_31, %c0_32] : memref<16x128xf32, #tpu.memory_space<vmem>>, vector<16x128xf32>
      tpu.vector_store %arg20[%c0_31, %c0_32], %40 {strides = array<i32>} : memref<16x128xf32, #tpu.memory_space<vmem>>, vector<16x128xf32>,
      %c0_i32_33 = arith.constant 0 : i32
      %c8_i32 = arith.constant 8 : i32
      %42 = arith.addi %c0_i32_33, %c8_i32 : i32
      %c1_i32_34 = arith.constant 1 : i32
      scf.for %arg24 = %c0_i32_33 to %42 step %c1_i32_34  : i32 {
        %48 = arith.index_cast %arg24 : i32 to index
        %49 = memref.load %arg4[%48] : memref<16xi32, #tpu.memory_space<smem>>
        %50 = arith.index_cast %49 : i32 to index
        %c0_42 = arith.constant 0 : index
        %51 = vector.load %arg19[%50, %c0_42] : memref<8x128xf32, #tpu.memory_space<vmem>>, vector<1x128xf32>
        %52 = arith.index_cast %arg24 : i32 to index
        %c0_43 = arith.constant 0 : index
        %53 = vector.load %arg20[%52, %c0_43] : memref<16x128xf32, #tpu.memory_space<vmem>>, vector<1x128xf32>
        %54 = arith.addf %51, %53 : vector<1x128xf32>
        %55 = arith.index_cast %49 : i32 to index
        %c0_44 = arith.constant 0 : index
        %56 = vector.load %arg19[%55, %c0_44] : memref<8x128xf32, #tpu.memory_space<vmem>>, vector<1x128xf32>
        tpu.vector_store %arg19[%55, %c0_44], %54 {strides = array<i32>} : memref<8x128xf32, #tpu.memory_space<vmem>>, vector<1x128xf32>,
      }
      %c8_i32_35 = arith.constant 8 : i32
      %c0_36 = arith.constant 0 : index
      %c0_37 = arith.constant 0 : index
      %43 = vector.load %arg19[%c0_36, %c0_37] : memref<8x128xf32, #tpu.memory_space<vmem>>, vector<8x128xf32>
      %c0_38 = arith.constant 0 : index
      %c0_39 = arith.constant 0 : index
      %44 = vector.load %arg8[%c0_38, %c0_39] : memref<8x1xf32, #tpu.memory_space<vmem>>, vector<8x1xf32>
      %45 = vector.broadcast %44 : vector<8x1xf32> to vector<8x128xf32>
      %46 = arith.mulf %43, %45 : vector<8x128xf32>
      %c0_40 = arith.constant 0 : index
      %c0_41 = arith.constant 0 : index
      %47 = vector.load %arg19[%c0_40, %c0_41] : memref<8x128xf32, #tpu.memory_space<vmem>>, vector<8x128xf32>
      tpu.vector_store %arg19[%c0_40, %c0_41], %46 {strides = array<i32>} : memref<8x128xf32, #tpu.memory_space<vmem>>, vector<8x128xf32>,
    } else {
    }
    return
  }
  func.func @transform_0(%arg0: i32, %arg1: i32, %arg2: memref<16xi32, #tpu.memory_space<smem>>, %arg3: memref<16xi32, #tpu.memory_space<smem>>, %arg4: memref<16xi32, #tpu.memory_space<smem>>) -> (i32, i32) {
    %c0_i32 = arith.constant 0 : i32
    %c0_i32_0 = arith.constant 0 : i32
    %c0_i32_1 = arith.constant 0 : i32
    return %c0_i32, %c0_i32_0 : i32, i32
  }
  func.func @transform_1(%arg0: i32, %arg1: i32, %arg2: memref<16xi32, #tpu.memory_space<smem>>, %arg3: memref<16xi32, #tpu.memory_space<smem>>, %arg4: memref<16xi32, #tpu.memory_space<smem>>) -> (i32, i32) {
    %c0_i32 = arith.constant 0 : i32
    %c0_i32_0 = arith.constant 0 : i32
    return %arg1, %c0_i32 : i32, i32
  }
  func.func @transform_2(%arg0: i32, %arg1: i32, %arg2: memref<16xi32, #tpu.memory_space<smem>>, %arg3: memref<16xi32, #tpu.memory_space<smem>>, %arg4: memref<16xi32, #tpu.memory_space<smem>>) -> (i32, i32) {
    %c0_i32 = arith.constant 0 : i32
    %c0_i32_0 = arith.constant 0 : i32
    %c0_i32_1 = arith.constant 0 : i32
    return %c0_i32, %c0_i32_0 : i32, i32
  }
  func.func @transform_3(%arg0: i32, %arg1: i32, %arg2: memref<16xi32, #tpu.memory_space<smem>>, %arg3: memref<16xi32, #tpu.memory_space<smem>>, %arg4: memref<16xi32, #tpu.memory_space<smem>>) -> (i32, i32) {
    %c0_i32 = arith.constant 0 : i32
    %c0_i32_0 = arith.constant 0 : i32
    %c0_i32_1 = arith.constant 0 : i32
    return %c0_i32, %c0_i32_0 : i32, i32
  }
  func.func @transform_4(%arg0: i32, %arg1: i32, %arg2: memref<16xi32, #tpu.memory_space<smem>>, %arg3: memref<16xi32, #tpu.memory_space<smem>>, %arg4: memref<16xi32, #tpu.memory_space<smem>>) -> (i32, i32) {
    %c0_i32 = arith.constant 0 : i32
    %c0_i32_0 = arith.constant 0 : i32
    %c0_i32_1 = arith.constant 0 : i32
    return %c0_i32, %c0_i32_0 : i32, i32
  }
  func.func @transform_5(%arg0: i32, %arg1: i32, %arg2: memref<16xi32, #tpu.memory_space<smem>>, %arg3: memref<16xi32, #tpu.memory_space<smem>>, %arg4: memref<16xi32, #tpu.memory_space<smem>>) -> (i32, i32) {
    %c0_i32 = arith.constant 0 : i32
    %c0_i32_0 = arith.constant 0 : i32
    %c0_i32_1 = arith.constant 0 : i32
    return %c0_i32, %c0_i32_0 : i32, i32
  }
  func.func @transform_6(%arg0: i32, %arg1: i32, %arg2: memref<16xi32, #tpu.memory_space<smem>>, %arg3: memref<16xi32, #tpu.memory_space<smem>>, %arg4: memref<16xi32, #tpu.memory_space<smem>>) -> (i32, i32) {
    %c0_i32 = arith.constant 0 : i32
    %c0_i32_0 = arith.constant 0 : i32
    %c0_i32_1 = arith.constant 0 : i32
    return %c0_i32, %c0_i32_0 : i32, i32
  }
  func.func @transform_7(%arg0: i32, %arg1: i32, %arg2: memref<16xi32, #tpu.memory_space<smem>>, %arg3: memref<16xi32, #tpu.memory_space<smem>>, %arg4: memref<16xi32, #tpu.memory_space<smem>>) -> (i32, i32) {
    %c0_i32 = arith.constant 0 : i32
    %c0_i32_0 = arith.constant 0 : i32
    %c0_i32_1 = arith.constant 0 : i32
    return %c0_i32, %c0_i32_0 : i32, i32
  }
  func.func @transform_8(%arg0: i32, %arg1: i32, %arg2: memref<16xi32, #tpu.memory_space<smem>>, %arg3: memref<16xi32, #tpu.memory_space<smem>>, %arg4: memref<16xi32, #tpu.memory_space<smem>>) -> (i32, i32) {
    %c0_i32 = arith.constant 0 : i32
    %c0_i32_0 = arith.constant 0 : i32
    %c0_i32_1 = arith.constant 0 : i32
    return %c0_i32, %c0_i32_0 : i32, i32
  }
  func.func @transform_9(%arg0: i32, %arg1: i32, %arg2: memref<16xi32, #tpu.memory_space<smem>>, %arg3: memref<16xi32, #tpu.memory_space<smem>>, %arg4: memref<16xi32, #tpu.memory_space<smem>>) -> (i32, i32) {
    %c0_i32 = arith.constant 0 : i32
    %c0_i32_0 = arith.constant 0 : i32
    %c0_i32_1 = arith.constant 0 : i32
    return %c0_i32, %c0_i32_0 : i32, i32
  }
  func.func @transform_10(%arg0: i32, %arg1: i32, %arg2: memref<16xi32, #tpu.memory_space<smem>>, %arg3: memref<16xi32, #tpu.memory_space<smem>>, %arg4: memref<16xi32, #tpu.memory_space<smem>>) -> (i32, i32) {
    %c0_i32 = arith.constant 0 : i32
    %c0_i32_0 = arith.constant 0 : i32
    %c0_i32_1 = arith.constant 0 : i32
    return %c0_i32, %c0_i32_0 : i32, i32
  }
  func.func @transform_11(%arg0: i32, %arg1: i32, %arg2: memref<16xi32, #tpu.memory_space<smem>>, %arg3: memref<16xi32, #tpu.memory_space<smem>>, %arg4: memref<16xi32, #tpu.memory_space<smem>>) -> (i32, i32) {
    %c0_i32 = arith.constant 0 : i32
    %c0_i32_0 = arith.constant 0 : i32
    %c0_i32_1 = arith.constant 0 : i32
    return %c0_i32, %c0_i32_0 : i32, i32
  }
  func.func @transform_12(%arg0: i32, %arg1: i32, %arg2: memref<16xi32, #tpu.memory_space<smem>>, %arg3: memref<16xi32, #tpu.memory_space<smem>>, %arg4: memref<16xi32, #tpu.memory_space<smem>>) -> (i32, i32) {
    %c0_i32 = arith.constant 0 : i32
    %c0_i32_0 = arith.constant 0 : i32
    %c0_i32_1 = arith.constant 0 : i32
    return %c0_i32, %c0_i32_0 : i32, i32
  }
  func.func @transform_13(%arg0: i32, %arg1: i32, %arg2: memref<16xi32, #tpu.memory_space<smem>>, %arg3: memref<16xi32, #tpu.memory_space<smem>>, %arg4: memref<16xi32, #tpu.memory_space<smem>>) -> (i32, i32) {
    %c0_i32 = arith.constant 0 : i32
    %c0_i32_0 = arith.constant 0 : i32
    %c0_i32_1 = arith.constant 0 : i32
    return %c0_i32, %c0_i32_0 : i32, i32
  }
  func.func @transform_14(%arg0: i32, %arg1: i32, %arg2: memref<16xi32, #tpu.memory_space<smem>>, %arg3: memref<16xi32, #tpu.memory_space<smem>>, %arg4: memref<16xi32, #tpu.memory_space<smem>>) -> (i32, i32) {
    %c0_i32 = arith.constant 0 : i32
    %c0_i32_0 = arith.constant 0 : i32
    %c0_i32_1 = arith.constant 0 : i32
    return %c0_i32, %c0_i32_0 : i32, i32
  }
}

</mosaic_0001>

<bundles_post_ra>
// kernel: tpu_custom_call.1
= control target key start
LH: loop header
LB: loop body
LE: loop exit
PB: predicated region body
PF: predicated region fallthrough
CT: control target
= control target key end

     0   :  { %s2508_s0 = inlined_call_operand.vmem [shape: s32[16], index: 0, kind: input, shape index: {}]   ;;  %s2509_s3 = inlined_call_operand.vmem [shape: f32[16,128], index: 3, kind: input, shape index: {}]   ;;  %s2510_s4 = inlined_call_operand.vmem [shape: f32[16,3], index: 4, kind: input, shape index: {}]   ;;  %s2511_s5 = inlined_call_operand.vmem [shape: f32[16,1], index: 5, kind: input, shape index: {}]   ;;  %s2512_s6 = inlined_call_operand.vmem [shape: f32[8,1], index: 6, kind: input, shape index: {}]   ;;  %s2513_s7 = inlined_call_operand.vmem [shape: f32[3,128], index: 7, kind: input, shape index: {}]   ;;  %s2514_s8 = inlined_call_operand.vmem [shape: f32[1,128], index: 8, kind: input, shape index: {}]   ;;  %s2515_s9 = inlined_call_operand.hbm [shape: f32[128,512], index: 9, kind: input, shape index: {}]   ;;  %s2516_s10 = inlined_call_operand.vmem [shape: f32[1,512], index: 10, kind: input, shape index: {}]   ;;  %s2517_s11 = inlined_call_operand.vmem [shape: f32[1,128], index: 11, kind: input, shape index: {}]   ;;  %s2518_s12 = inlined_call_operand.vmem [shape: f32[3,128], index: 12, kind: input, shape index: {}]   ;;  %s2519_s13 = inlined_call_operand.vmem [shape: f32[1,128], index: 13, kind: input, shape index: {}]   ;;  %s2520_s14 = inlined_call_operand.hbm [shape: f32[128,1024], index: 14, kind: input, shape index: {}]   ;;  %s2521_s15 = inlined_call_operand.vmem [shape: f32[1,1024], index: 15, kind: input, shape index: {}]   ;;  %s2522_s16 = inlined_call_operand.vmem [shape: f32[1,128], index: 16, kind: input, shape index: {}]   ;;  %s2523_s17 = inlined_call_operand.hbm [shape: f32[8,128], index: 17, kind: output, shape index: {}]   ;;  %s2524_s1 = inlined_call_operand.vmem [shape: s32[16], index: 1, kind: input, shape index: {}]   ;;  %s2525_s2 = inlined_call_operand.vmem [shape: s32[16], index: 2, kind: input, shape index: {}]  }
   0x1   :  { %2528 = sst [smem:[#allocation20_spill]] %s2508_s0  ;;  %s26_s29 = sshll.u32 %s2524_s1, 4  ;;  %s27_s29 = int_to_ptr.vmem [resolvable:$true] %s26_s29 }
   0x2   :  { %2529 = sst [smem:[#allocation21_spill]] %s2509_s3 }
   0x3   :  { %2530 = sst [smem:[#allocation22_spill]] %s2512_s6 }
   0x4   :  { %s2531_s26 = sld [smem:[#allocation20_spill]] }
   0xa   :  { %s22_s6 = sshll.u32 %s2531_s26, 4  ;;  %s23_s6 = int_to_ptr.vmem [resolvable:$true] %s22_s6 }
   0xb   :  { %s1997_s0 = scalar_lea.vmem %s23_s6, 16  ;;  %p2002_p1 = scmp.lt.s32.totalorder %s23_s6, %s23_s6 }
   0xc   :  { %p1998_p0 = scmp.ne.s32.totalorder %s23_s6, %s1997_s0  ;;  %p2003_p2 = scmp.lt.s32.totalorder %s1997_s0, %s1997_s0 }
   0xe   :  { %p2004_p3 = por %p2003_p2, %p2002_p1 }
  0x10   :  { %p2005_p4 = pnand %p2004_p3, %p1998_p0 }
  0x12   :  { %2008 = shalt.err (!%p2005_p4)  }
  0x13   :  { %s2171_s30 = smov [#allocation7]   ;;  %s2009_s18 = scalar_lea.vmem %s27_s29, 16 }
  0x14   :  { %25 = dma.vmem_to_smem %s23_s6, 16, %s2171_s30, [#allocation6] }
  0x15   :  { %p2010_p5 = scmp.ne.s32.totalorder %s27_s29, %s2009_s18  ;;  %p2014_p6 = scmp.lt.s32.totalorder %s27_s29, %s27_s29 }
  0x16   :  { %p2015_p7 = scmp.lt.s32.totalorder %s2009_s18, %s2009_s18 }
  0x18   :  { %p2016_p8 = por %p2015_p7, %p2014_p6 }
  0x1a   :  { %p2017_p9 = pnand %p2016_p8, %p2010_p5 }
  0x1c   :  { %2020 = shalt.err (!%p2017_p9)  }
  0x1d   :  { %s2172_s19 = smov [#allocation8]   ;;  %s30_s20 = sshll.u32 %s2525_s2, 4  ;;  %s31_s20 = int_to_ptr.vmem [resolvable:$true] %s30_s20 }
  0x1e   :  { %29 = dma.vmem_to_smem %s27_s29, 16, %s2172_s19, [#allocation6] }
  0x1f   :  { %s2021_s21 = scalar_lea.vmem %s31_s20, 16  ;;  %p2026_p11 = scmp.lt.s32.totalorder %s31_s20, %s31_s20 }
  0x20   :  { %p2022_p10 = scmp.ne.s32.totalorder %s31_s20, %s2021_s21  ;;  %p2027_p12 = scmp.lt.s32.totalorder %s2021_s21, %s2021_s21 }
  0x22   :  { %p2028_p13 = por %p2027_p12, %p2026_p11 }
  0x24   :  { %p2029_p0 = pnand %p2028_p13, %p2022_p10 }
  0x26   :  { %2032 = shalt.err (!%p2029_p0)  }
  0x27   :  { %s2173_s6 = smov [#allocation9]  }
  0x28   :  { %33 = dma.vmem_to_smem %s31_s20, 16, %s2173_s6, [#allocation6] }
  0x29   :  { %2133 = dma.done.wait [#allocation6], 48 }
  0x2a   :  { %2134 = vsyncadd [#allocation6], 4294967248 }
  0x2b   :  { %35 = sfence }
  0x2c   :  { %36 = vsyncpa [#allocation11], 0 }
  0x2d   :  { %37 = vsyncpa [#allocation14], 0 }
  0x2e   :  { %38 = vsyncpa [#allocation12], 0  ;;  %s2298_s22 = smov 0   ;;  %s2300_s23 = smov 0  }
  0x2f   :  { %s2302_s2 = smov 0  }
  0x30 LB: > { %s2527_s24 = sadd.s32 4294967295, %s2157_s2   ;;  %s56_s25 = sadd.s32 1, %s2153_s23  ;;  %s2157_s2 = sphi %s2302_s2, %s44_s2   ;;  %s2153_s23 = sphi %s2300_s23, %s2540_s23   ;;  %s2149_s22 = sphi %s2298_s22, %s2539_s22  }
  0x31   : > { %p58_p1 = scmp.ge.s32.totalorder %s56_s25, 2  ;;  %p1831_p2 = scmp.ge.s32.totalorder %s2157_s2, 1 }
  0x32   : > { %p381_p3 = scmp.lt.s32.totalorder %s2157_s2, 3  ;;  %p2325_p5 = scmp.eq.s32.totalorder %s2527_s24, 0 }
  0x33   : > { %s2542_s25 = smov (%p58_p1, %s56_s25), 0  ;;  %s2174_s28 = smov [#allocation10]  }
  0x34   : > { %p2319_p4 = pnand %p1831_p2, %p381_p3  ;;  %s417_s29 = sshll.u32 %s2174_s28, 4  ;;  %s418_s29 = int_to_ptr.vmem [resolvable:$true] %s417_s29 }
  0x35   : > { %s2175_s30 = smov [#allocation13]   ;;  %s2044_s19 = scalar_lea.vmem %s418_s29, 8192 }
  0x36   : > { %p1886_p6 = pneg %p2319_p4  ;;  %s442_s18 = sshll.u32 %s2175_s30, 4  ;;  %s443_s18 = int_to_ptr.vmem [resolvable:$true] %s442_s18 }
  0x37   : > { %p2045_p9 = scmp.ne.s32.totalorder %s418_s29, %s2044_s19  ;;  %p2052_p12 = scmp.lt.s32.totalorder %s418_s29, %s418_s29 }
  0x38   : > { %p2333_p7 = pnand %p2325_p5, %p1886_p6  ;;  %p2053_p13 = scmp.lt.s32.totalorder %s2044_s19, %s2044_s19 }
  0x3a   : > { %p2035_p8 = pneg %p2333_p7  ;;  %p2054_p0 = por %p2053_p13, %p2052_p12 }
  0x3c   : > { %p2047_p10 = pnand %p2045_p9, %p2035_p8 }
  0x3e   : > { %p2048_p11 = pneg %p2047_p10 }
  0x40   : > { %p2055_p1 = pnand %p2054_p0, %p2048_p11 }
  0x42   : > { %2058 = shalt.err (!%p2055_p1)
}
  0x43   : > { %s2176_s1 = smov 512   ;;  %s2177_s3 = smov 32  }
  0x44   : > { %1889 = dma.hbm_to_vmem [thread:$0]  (!%p2333_p7), %s2515_s9, 8192, %s418_s29, [#allocation11], %s2176_s1, %s2176_s1, %s2177_s3  }
  0x45   : > { %s2070_s6 = scalar_lea.vmem %s443_s18, 16384  ;;  %p2078_p9 = scmp.lt.s32.totalorder %s443_s18, %s443_s18 }
  0x46   : > { %p2071_p2 = scmp.ne.s32.totalorder %s443_s18, %s2070_s6  ;;  %p2079_p10 = scmp.lt.s32.totalorder %s2070_s6, %s2070_s6 }
  0x48   : > { %p2073_p3 = pnand %p2071_p2, %p2035_p8  ;;  %p2080_p12 = por %p2079_p10, %p2078_p9 }
  0x4a   : > { %p2074_p6 = pneg %p2073_p3 }
  0x4c   : > { %p2081_p11 = pnand %p2080_p12, %p2074_p6 }
  0x4e   : > { %2084 = shalt.err (!%p2081_p11)
}
  0x4f   : > { %s2178_s28 = smov 1024   ;;  %s2179_s30 = smov 64  }
  0x50   : > { %1892 = dma.hbm_to_vmem [thread:$0]  (!%p2333_p7), %s2520_s14, 16384, %s443_s18, [#allocation14], %s2178_s28, %s2178_s28, %s2179_s30  }
  0x51   : > { %464 = sbr.rel (%p2319_p4) target bundleno = 1424 (0x590), region = 76 }
  0x56   : > { %2136 = dma.done.wait (%p2325_p5), [#allocation11], 8192  }
  0x57   : > { %2138 = vsyncadd (%p2325_p5), [#allocation11], 4294959104 }
  0x58   : > { %2140 = dma.done.wait (%p2325_p5), [#allocation14], 16384  }
  0x59   : > { %2142 = vsyncadd (%p2325_p5), [#allocation14], 4294950912  ;;  %p516_p8 = scmp.eq.s32.totalorder %s2149_s22, 0 }
  0x5a   : > { %s2535_s29 = sld [smem:[#allocation21_spill]] (%p516_p8)  ;;  %v2180_v2 = vmov (%p516_p8), 0.0  }
  0x5b   : > { %521 = sbr.rel (!%p516_p8) target bundleno = 98 (0x62), region = 88  ;;  %526 = vst [vmem:[#allocation15] sm:$0xff] (%p516_p8), %v2180_v2 }
  0x60   : > { %v522_v0 = vld [vmem:[%s2535_s29] sm:$0xff]  ;;  %v523_v1 = vld [vmem:[%s2535_s29 + $0x8] sm:$0xff] }
  0x61   : > { %524 = vst [vmem:[#allocation2] sm:$0xff] %v522_v0  ;;  %525 = vst [vmem:[#allocation2 + $0x8] sm:$0xff] %v523_v1 }
  0x62 PF: > { %v2181_v3 = vmov 0.0   ;;  %s2159_s27 = smov 0  }
  0x63   : > { %530 = vst [vmem:[#allocation3] sm:$0xff] %v2181_v3  ;;  %531 = vst [vmem:[#allocation3 + $0x8] sm:$0xff] %v2181_v3 }
  0x64 LB: >> { %s539_s1 = sld [smem:[#allocation7 + %s2161_s27]]  ;;  %s542_s20 = scalar_lea.vmem [#allocation4], %s2161_s27  ;;  %s2161_s27 = sphi %s2159_s27, %s537_s27  }
  0x65   : >> { %s537_s27 = sadd.s32 1, %s2161_s27  }
  0x66   : >> { %p534_p4 = scmp.ge.s32.totalorder %s537_s27, 16  }
  0x67   : > { %v2377_v5 = vld [vmem:[%s2510_s4] sm:$0xff] (%p534_p4)  ;;  %v2382_v6 = vld [vmem:[%s2510_s4 + $0x8] sm:$0xff] (%p534_p4)  ;;  %p1839_p5 = scmp.ne.s32.totalorder (%p534_p4), %s2149_s22, 0 }
  0x68   : > { %536 = sbr.rel (!%p534_p4) target bundleno = 100 (0x64), region = 163 }
  0x6a   : >> { %s540_s3 = scalar_lea.vmem [#allocation2], %s539_s1 }
  0x6b   : >> { %v541_v4 = vld [vmem:[%s540_s3] sm:$0x1] }
  0x6c   : >> { %543 = vst [vmem:[%s542_s20] sm:$0x1] %v541_v4 }
  0x6f   : > { %550 = sbr.rel (%p1839_p5) target bundleno = 529 (0x211), region = 103 }
  0x73   : > { %v2384_v7 = vld [vmem:[#allocation4] sm:$0xff]  ;;  %v2386_v8 = vld [vmem:[#allocation4 + $0x8] sm:$0xff] }
  0x74   : > { %v551_v9 = vld [vmem:[%s2513_s7] sm:$0x7]  ;;  %vm566_vm0 = vcmask 1042432   ;;  %vm559_vm1 = vcmask 23552   ;;  %v712_v10 = vld [vmem:[#allocation10 + $0x1e8] sm:$0xff]  ;;  %v714_v11 = vld [vmem:[#allocation10 + $0x1f8] sm:$0xff] }
  0x75   : > { %1864 = vmatprep.subr.msk.mxu0 %vm566_vm0, %v551_v9  ;;  %1866 = vmatprep.mubr.msk.f32.mxu0 %vm559_vm1, %v2377_v5  ;;  %v711_v12 = vld [vmem:[#allocation10 + $0x1e0] sm:$0xff]  ;;  %v713_v13 = vld [vmem:[#allocation10 + $0x1f0] sm:$0xff]  ;;  %v708_v14 = vld [vmem:[#allocation10 + $0x1c8] sm:$0xff] }
  0x76   : > { %1865 = vmatpush3.msk.msra.mxu0 %vm566_vm0, %v551_v9  ;;  %737 = vmatprep.subr.mxu1 %v712_v10  ;;  %v710_v15 = vld [vmem:[#allocation10 + $0x1d8] sm:$0xff]  ;;  %v707_v16 = vld [vmem:[#allocation10 + $0x1c0] sm:$0xff]  ;;  %v709_v17 = vld [vmem:[#allocation10 + $0x1d0] sm:$0xff] }
  0x77   : > { %1867 = vmatmul.mubr.msk.f32.vlgmr.msra.gmra.mxu0 %vm559_vm1, %v2382_v6  ;;  %814 = vmatprep.subr.mxu0 %v714_v11  ;;  %v704_v18 = vld [vmem:[#allocation10 + $0x1a8] sm:$0xff]  ;;  %v706_v19 = vld [vmem:[#allocation10 + $0x1b8] sm:$0xff]  ;;  %v703_v20 = vld [vmem:[#allocation10 + $0x1a0] sm:$0xff] }
  0x78   : > { %738 = vmatpush1.msra.mxu1 %v711_v12  ;;  %815 = vmatpush1.msra.mxu0 %v713_v13  ;;  %v705_v21 = vld [vmem:[#allocation10 + $0x1b0] sm:$0xff]  ;;  %v700_v22 = vld [vmem:[#allocation10 + $0x188] sm:$0xff]  ;;  %v702_v23 = vld [vmem:[#allocation10 + $0x198] sm:$0xff] }
  0x79   : > { %739 = vmatprep.subr.mxu1 %v708_v14  ;;  %816 = vmatprep.subr.mxu0 %v710_v15  ;;  %v699_v24 = vld [vmem:[#allocation10 + $0x180] sm:$0xff]  ;;  %v701_v25 = vld [vmem:[#allocation10 + $0x190] sm:$0xff]  ;;  %v696_v26 = vld [vmem:[#allocation10 + $0x168] sm:$0xff]  ;;  %v2182_v14 = vmov 0.0   ;;  %v2183_v15 = vmov 1  }
  0x7a   : > { %740 = vmatpush1.msra.mxu1 %v707_v16  ;;  %817 = vmatpush1.msra.mxu0 %v709_v17  ;;  %v698_v27 = vld [vmem:[#allocation10 + $0x178] sm:$0xff]  ;;  %v695_v28 = vld [vmem:[#allocation10 + $0x160] sm:$0xff]  ;;  %v697_v29 = vld [vmem:[#allocation10 + $0x170] sm:$0xff]  ;;  %v2184_v16 = vmov 0   ;;  %v2185_v17 = vmov 2  }
  0x7b   : > { %741 = vmatprep.subr.mxu1 %v704_v18  ;;  %818 = vmatprep.subr.mxu0 %v706_v19  ;;  %v692_v30 = vld [vmem:[#allocation10 + $0x148] sm:$0xff]  ;;  %v694_v31 = vld [vmem:[#allocation10 + $0x158] sm:$0xff]  ;;  %v691_v32 = vld [vmem:[#allocation10 + $0x140] sm:$0xff]  ;;  %v2186_v18 = vmov 3  }
  0x7c   : > { %742 = vmatpush1.msra.mxu1 %v703_v20  ;;  %819 = vmatpush1.msra.mxu0 %v705_v21  ;;  %v693_v33 = vld [vmem:[#allocation10 + $0x150] sm:$0xff]  ;;  %v688_v34 = vld [vmem:[#allocation10 + $0x128] sm:$0xff]  ;;  %v690_v35 = vld [vmem:[#allocation10 + $0x138] sm:$0xff] }
  0x7d   : > { %743 = vmatprep.subr.mxu1 %v700_v22  ;;  %820 = vmatprep.subr.mxu0 %v702_v23  ;;  %v687_v36 = vld [vmem:[#allocation10 + $0x120] sm:$0xff]  ;;  %v689_v37 = vld [vmem:[#allocation10 + $0x130] sm:$0xff]  ;;  %v684_v38 = vld [vmem:[#allocation10 + $0x108] sm:$0xff] }
  0x7e   : > { %744 = vmatpush1.msra.mxu1 %v699_v24  ;;  %821 = vmatpush1.msra.mxu0 %v701_v25  ;;  %v686_v39 = vld [vmem:[#allocation10 + $0x118] sm:$0xff]  ;;  %v683_v40 = vld [vmem:[#allocation10 + $0x100] sm:$0xff]  ;;  %v685_v41 = vld [vmem:[#allocation10 + $0x110] sm:$0xff] }
  0x7f   : > { %745 = vmatprep.subr.mxu1 %v696_v26  ;;  %822 = vmatprep.subr.mxu0 %v698_v27  ;;  %v680_v42 = vld [vmem:[#allocation10 + $0xe8] sm:$0xff]  ;;  %v682_v43 = vld [vmem:[#allocation10 + $0xf8] sm:$0xff]  ;;  %v679_v44 = vld [vmem:[#allocation10 + $0xe0] sm:$0xff] }
  0x80   : > { %746 = vmatpush1.msra.mxu1 %v695_v28  ;;  %823 = vmatpush1.msra.mxu0 %v697_v29  ;;  %v681_v45 = vld [vmem:[#allocation10 + $0xf0] sm:$0xff]  ;;  %v676_v46 = vld [vmem:[#allocation10 + $0xc8] sm:$0xff]  ;;  %v678_v47 = vld [vmem:[#allocation10 + $0xd8] sm:$0xff]  ;;  %v717_v28 = vlaneseq }
  0x81   : > { %747 = vmatprep.subr.mxu1 %v692_v30  ;;  %824 = vmatprep.subr.mxu0 %v694_v31  ;;  %v675_v48 = vld [vmem:[#allocation10 + $0xc0] sm:$0xff]  ;;  %v677_v49 = vld [vmem:[#allocation10 + $0xd0] sm:$0xff]  ;;  %v672_v50 = vld [vmem:[#allocation10 + $0xa8] sm:$0xff] }
  0x82   : > { %748 = vmatpush1.msra.mxu1 %v691_v32  ;;  %825 = vmatpush1.msra.mxu0 %v693_v33  ;;  %v674_v51 = vld [vmem:[#allocation10 + $0xb8] sm:$0xff]  ;;  %v671_v52 = vld [vmem:[#allocation10 + $0xa0] sm:$0xff]  ;;  %v673_v53 = vld [vmem:[#allocation10 + $0xb0] sm:$0xff]  ;;  %v718_v30 = vshrl.u32 %v717_v28, 7 }
  0x83   : > { %749 = vmatprep.subr.mxu1 %v688_v34  ;;  %826 = vmatprep.subr.mxu0 %v690_v35  ;;  %v668_v54 = vld [vmem:[#allocation10 + $0x88] sm:$0xff]  ;;  %v670_v55 = vld [vmem:[#allocation10 + $0x98] sm:$0xff]  ;;  %v667_v56 = vld [vmem:[#allocation10 + $0x80] sm:$0xff] }
  0x84   : > { %750 = vmatpush1.msra.mxu1 %v687_v36  ;;  %827 = vmatpush1.msra.mxu0 %v689_v37  ;;  %v669_v57 = vld [vmem:[#allocation10 + $0x90] sm:$0xff]  ;;  %v664_v58 = vld [vmem:[#allocation10 + $0x68] sm:$0xff]  ;;  %v666_v59 = vld [vmem:[#allocation10 + $0x78] sm:$0xff]  ;;  %v719_v33 = vsub.s32 0, %v718_v30  ;;  %v727_v35 = vsub.s32 2, %v718_v30  ;;  %v723_v36 = vsub.s32 1, %v718_v30 }
  0x85   : > { %751 = vmatprep.subr.mxu1 %v684_v38  ;;  %828 = vmatprep.subr.mxu0 %v686_v39  ;;  %v663_v60 = vld [vmem:[#allocation10 + $0x60] sm:$0xff]  ;;  %v665_v61 = vld [vmem:[#allocation10 + $0x70] sm:$0xff]  ;;  %v660_v62 = vld [vmem:[#allocation10 + $0x48] sm:$0xff]  ;;  %v731_v37 = vsub.s32 3, %v718_v30 }
  0x86   : > { %752 = vmatpush1.msra.mxu1 %v683_v40  ;;  %829 = vmatpush1.msra.mxu0 %v685_v41  ;;  %v662_v63 = vld [vmem:[#allocation10 + $0x58] sm:$0xff]  ;;  %v659_v0 = vld [vmem:[#allocation10 + $0x40] sm:$0xff]  ;;  %v661_v1 = vld [vmem:[#allocation10 + $0x50] sm:$0xff] }
  0x87   : > { %753 = vmatprep.subr.mxu1 %v680_v42  ;;  %830 = vmatprep.subr.mxu0 %v682_v43  ;;  %v656_v2 = vld [vmem:[#allocation10 + $0x28] sm:$0xff]  ;;  %v658_v3 = vld [vmem:[#allocation10 + $0x38] sm:$0xff]  ;;  %v655_v4 = vld [vmem:[#allocation10 + $0x20] sm:$0xff] }
  0x88   : > { %754 = vmatpush1.msra.mxu1 %v679_v44  ;;  %831 = vmatpush1.msra.mxu0 %v681_v45  ;;  %v657_v9 = vld [vmem:[#allocation10 + $0x30] sm:$0xff]  ;;  %v652_v10 = vld [vmem:[#allocation10 + $0x8] sm:$0xff]  ;;  %v654_v11 = vld [vmem:[#allocation10 + $0x18] sm:$0xff] }
  0x89   : > { %755 = vmatprep.subr.mxu1 %v676_v46  ;;  %832 = vmatprep.subr.mxu0 %v678_v47  ;;  %v651_v12 = vld [vmem:[#allocation10] sm:$0xff]  ;;  %v653_v13 = vld [vmem:[#allocation10 + $0x10] sm:$0xff] }
  0x8a   : > { %756 = vmatpush1.msra.mxu1 %v675_v48  ;;  %833 = vmatpush1.msra.mxu0 %v677_v49  ;;  %v1840_v20 = vld [vmem:[%s2514_s8] ss:$0 sm:$0xff] }
  0x8b   : > { %757 = vmatprep.subr.mxu1 %v672_v50  ;;  %834 = vmatprep.subr.mxu0 %v674_v51  ;;  %v715_v34 = vld [vmem:[%s2516_s10] sm:$0xf] }
  0x8c   : > { %758 = vmatpush1.msra.mxu1 %v671_v52  ;;  %835 = vmatpush1.msra.mxu0 %v673_v53  ;;  %v720_v39 = vrot.slane %v715_v34, %v719_v33  ;;  %v728_v41 = vrot.slane %v715_v34, %v727_v35  ;;  %v724_v42 = vrot.slane %v715_v34, %v723_v36 }
  0x8d   : > { %759 = vmatprep.subr.mxu1 %v668_v54  ;;  %836 = vmatprep.subr.mxu0 %v670_v55  ;;  %v732_v45 = vrot.slane %v715_v34, %v731_v37 }
  0x8e   : > { %760 = vmatpush1.msra.mxu1 %v667_v56  ;;  %837 = vmatpush1.msra.mxu0 %v669_v57 }
  0x8f   : > { %761 = vmatprep.subr.mxu1 %v664_v58  ;;  %838 = vmatprep.subr.mxu0 %v666_v59 }
  0x90   : > { %762 = vmatpush1.msra.mxu1 %v663_v60  ;;  %839 = vmatpush1.msra.mxu0 %v665_v61 }
  0x91   : > { %763 = vmatprep.subr.mxu1 %v660_v62  ;;  %840 = vmatprep.subr.mxu0 %v662_v63 }
  0x92   : > { %764 = vmatpush1.msra.mxu1 %v659_v0  ;;  %841 = vmatpush1.msra.mxu0 %v661_v1 }
  0x93   : > { %765 = vmatprep.subr.mxu1 %v656_v2  ;;  %842 = vmatprep.subr.mxu0 %v658_v3 }
  0x94   : > { %766 = vmatpush1.msra.mxu1 %v655_v4  ;;  %843 = vmatpush1.msra.mxu0 %v657_v9 }
  0x95   : > { %767 = vmatprep.subr.mxu1 %v652_v10  ;;  %844 = vmatprep.subr.mxu0 %v654_v11 }
  0x96   : > { %768 = vmatpush1.msra.mxu1 %v651_v12  ;;  %801 = vmatprep.mubr.f32.mxu1 %v2182_v14 }
  0x97   : > { %845 = vmatpush1.msra.mxu0 %v653_v13  ;;  %878 = vmatprep.mubr.f32.mxu0 %v2182_v14 }
  0x98   : > { %1976 = vset.pattern.permute.xlu1 %v2183_v15  ;;  %1975 = vset.pattern.permute.xlu0 %v2184_v16 }
  0x99   : > { %904 = vperm.xlu1 %1976, %v2384_v7   ;;  %893 = vperm.xlu0 %1975, %v2384_v7  }
  0x9d   : > { %908 = vperm.xlu1 %1976, %v2386_v8   ;;  %898 = vperm.xlu0 %1975, %v2386_v8  }
  0xa1   : > { %1978 = vset.pattern.permute.xlu1 %v2185_v17  ;;  %1977 = vset.pattern.permute.xlu0 %v2185_v17 }
  0xa2   : > { %920 = vperm.xlu1 %1978, %v2386_v8   ;;  %916 = vperm.xlu0 %1977, %v2384_v7  }
  0xa6   : > { %1979 = vset.pattern.permute.xlu1 %v2186_v18  ;;  %1980 = vset.pattern.permute.xlu0 %v2186_v18 }
  0xa7   : > { %928 = vperm.xlu1 %1979, %v2384_v7   ;;  %932 = vperm.xlu0 %1980, %v2386_v8  }
 0x114   : > { %v905_v29 = vpop.permute.xlu1 %904  ;;  %v894_v31 = vpop.permute.xlu0 %893 }
 0x118   : > { %v909_v32 = vpop.permute.xlu1 %908  ;;  %v899_v38 = vpop.permute.xlu0 %898 }
 0x11d   : > { %v921_v40 = vpop.permute.xlu1 %920  ;;  %v917_v50 = vpop.permute.xlu0 %916 }
 0x122   : > { %v929_v57 = vpop.permute.xlu1 %928  ;;  %v933_v10 = vpop.permute.xlu0 %932 }
 0x137   : > { %v1868_v19 = vpop.f32.mrf.mxu0 }
 0x138   : > { %v642_v22 = vadd.f32 %v1868_v19, %v1840_v20 }
 0x139   : > { %v636_v21 = vpop.f32.mrf.mxu0 }
 0x13a   : > { %v637_v23 = vadd.f32 %v1840_v20, %v636_v21  ;;  %v648_v25 = vmul.f32 0.01, %v642_v22  ;;  %vm646_vm3 = vcmp.ge.f32.partialorder %v642_v22, 0.0 }
 0x13c   : > { %v647_v24 = vmul.f32 0.01, %v637_v23  ;;  %vm645_vm2 = vcmp.ge.f32.partialorder %v637_v23, 0.0  ;;  %v650_v27 = vsel %vm646_vm3, %v642_v22, %v648_v25 }
 0x13e   : > { %v649_v26 = vsel %vm645_vm2, %v637_v23, %v647_v24 }
 0x13f   : > { %802 = vmatmul.mubr.f32.vlgmr.msra.gmra.mxu1 %v649_v26  ;;  %879 = vmatmul.mubr.f32.vlgmr.msra.gmra.mxu0 %v649_v26 }
 0x140   : > { %807 = vmatprep.mubr.f32.mxu1 %v2182_v14  ;;  %884 = vmatprep.mubr.f32.mxu0 %v2182_v14 }
 0x143   : > { %808 = vmatmul.mubr.f32.gmra.mxu1 %v650_v27  ;;  %885 = vmatmul.mubr.f32.gmra.mxu0 %v650_v27 }
 0x1ff   : > { %v803_v43 = vpop.f32.mrf.mxu1  ;;  %v880_v44 = vpop.f32.mrf.mxu0 }
 0x200   : > { %v804_v46 = vadd.f32 %v803_v43, %v720_v39  ;;  %v881_v49 = vadd.f32 %v880_v44, %v728_v41 }
 0x201   : > { %v805_v47 = vpop.f32.mrf.mxu1  ;;  %v882_v48 = vpop.f32.mrf.mxu0 }
 0x202   : > { %v806_v51 = vadd.f32 %v805_v47, %v724_v42  ;;  %v883_v52 = vadd.f32 %v882_v48, %v732_v45  ;;  %v901_v55 = vmul.f32 %v894_v31, %v804_v46  ;;  %v923_v61 = vmul.f32 %v917_v50, %v881_v49 }
 0x203   : > { %v809_v53 = vpop.f32.mrf.mxu1  ;;  %v886_v54 = vpop.f32.mrf.mxu0 }
 0x204   : > { %v911_v56 = vmul.f32 %v905_v29, %v806_v51  ;;  %v810_v58 = vadd.f32 %v809_v53, %v720_v39  ;;  %v887_v63 = vadd.f32 %v886_v54, %v728_v41  ;;  %v935_v1 = vmul.f32 %v929_v57, %v883_v52 }
 0x205   : > { %v811_v59 = vpop.f32.mrf.mxu1  ;;  %v888_v60 = vpop.f32.mrf.mxu0 }
 0x206   : > { %v913_v62 = vadd.f32 %v911_v56, %v901_v55  ;;  %v812_v0 = vadd.f32 %v811_v59, %v724_v42  ;;  %v902_v3 = vmul.f32 %v899_v38, %v810_v58  ;;  %v889_v9 = vadd.f32 %v888_v60, %v732_v45 }
 0x207   : > { %v924_v12 = vmul.f32 %v921_v40, %v887_v63 }
 0x208   : > { %v925_v2 = vadd.f32 %v923_v61, %v913_v62  ;;  %v912_v4 = vmul.f32 %v909_v32, %v812_v0  ;;  %v936_v15 = vmul.f32 %v933_v10, %v889_v9 }
 0x20a   : > { %v937_v11 = vadd.f32 %v935_v1, %v925_v2  ;;  %v914_v13 = vadd.f32 %v912_v4, %v902_v3 }
 0x20c   : > { %939 = vst [vmem:[#allocation5] sm:$0xff] %v937_v11  ;;  %v926_v14 = vadd.f32 %v924_v12, %v914_v13 }
 0x20e   : > { %v938_v16 = vadd.f32 %v936_v15, %v926_v14 }
 0x210   : > { %940 = vst [vmem:[#allocation5 + $0x8] sm:$0xff] %v938_v16 }
 0x211 PF: > { %p941_p7 = scmp.eq.s32.totalorder %s2149_s22, 1  ;;  %p1844_p13 = scmp.ne.s32.totalorder %s2149_s22, 1 }
 0x213   : > { %944 = sbr.rel (%p1844_p13) target bundleno = 984 (0x3d8), region = 107 }
 0x218   : > { %v945_v17 = vld [vmem:[%s2518_s12] sm:$0x7]  ;;  %vm960_vm4 = vcmask 1042432   ;;  %vm953_vm5 = vcmask 23552   ;;  %v1166_v18 = vld [vmem:[#allocation13 + $0x3c8] sm:$0xff]  ;;  %v1168_v19 = vld [vmem:[#allocation13 + $0x3d8] sm:$0xff] }
 0x219   : > { %1869 = vmatprep.subr.msk.mxu0 %vm960_vm4, %v945_v17  ;;  %1871 = vmatprep.mubr.msk.f32.mxu0 %vm953_vm5, %v2377_v5  ;;  %v1165_v20 = vld [vmem:[#allocation13 + $0x3c0] sm:$0xff]  ;;  %v1167_v21 = vld [vmem:[#allocation13 + $0x3d0] sm:$0xff]  ;;  %v1158_v22 = vld [vmem:[#allocation13 + $0x388] sm:$0xff] }
 0x21a   : > { %1870 = vmatpush3.msk.msra.mxu0 %vm960_vm4, %v945_v17  ;;  %1215 = vmatprep.subr.mxu1 %v1166_v18  ;;  %v1160_v23 = vld [vmem:[#allocation13 + $0x398] sm:$0xff]  ;;  %v1157_v24 = vld [vmem:[#allocation13 + $0x380] sm:$0xff]  ;;  %v1159_v25 = vld [vmem:[#allocation13 + $0x390] sm:$0xff] }
 0x21b   : > { %1872 = vmatmul.mubr.msk.f32.vlgmr.msra.gmra.mxu0 %vm953_vm5, %v2382_v6  ;;  %1292 = vmatprep.subr.mxu0 %v1168_v19  ;;  %v1150_v26 = vld [vmem:[#allocation13 + $0x348] sm:$0xff]  ;;  %v1152_v27 = vld [vmem:[#allocation13 + $0x358] sm:$0xff]  ;;  %v1149_v28 = vld [vmem:[#allocation13 + $0x340] sm:$0xff] }
 0x21c   : > { %1216 = vmatpush1.msra.mxu1 %v1165_v20  ;;  %1293 = vmatpush1.msra.mxu0 %v1167_v21  ;;  %v1151_v29 = vld [vmem:[#allocation13 + $0x350] sm:$0xff]  ;;  %v1142_v5 = vld [vmem:[#allocation13 + $0x308] sm:$0xff]  ;;  %v1144_v30 = vld [vmem:[#allocation13 + $0x318] sm:$0xff] }
 0x21d   : > { %1217 = vmatprep.subr.mxu1 %v1158_v22  ;;  %1294 = vmatprep.subr.mxu0 %v1160_v23  ;;  %v1141_v31 = vld [vmem:[#allocation13 + $0x300] sm:$0xff]  ;;  %v1143_v32 = vld [vmem:[#allocation13 + $0x310] sm:$0xff]  ;;  %v1134_v6 = vld [vmem:[#allocation13 + $0x2c8] sm:$0xff]  ;;  %v2187_v22 = vmov 0.0   ;;  %v2188_v23 = vmov 1  }
 0x21e   : > { %1218 = vmatpush1.msra.mxu1 %v1157_v24  ;;  %1295 = vmatpush1.msra.mxu0 %v1159_v25  ;;  %v1136_v33 = vld [vmem:[#allocation13 + $0x2d8] sm:$0xff]  ;;  %v1133_v34 = vld [vmem:[#allocation13 + $0x2c0] sm:$0xff]  ;;  %v1135_v35 = vld [vmem:[#allocation13 + $0x2d0] sm:$0xff]  ;;  %v2189_v24 = vmov 0   ;;  %v2190_v25 = vmov 2  }
 0x21f   : > { %1219 = vmatprep.subr.mxu1 %v1150_v26  ;;  %1296 = vmatprep.subr.mxu0 %v1152_v27  ;;  %v1126_v36 = vld [vmem:[#allocation13 + $0x288] sm:$0xff]  ;;  %v1128_v37 = vld [vmem:[#allocation13 + $0x298] sm:$0xff]  ;;  %v1125_v38 = vld [vmem:[#allocation13 + $0x280] sm:$0xff]  ;;  %v2191_v26 = vmov 3   ;;  %v2192_v27 = vmov 4  }
 0x220   : > { %1220 = vmatpush1.msra.mxu1 %v1149_v28  ;;  %1297 = vmatpush1.msra.mxu0 %v1151_v29  ;;  %v1127_v39 = vld [vmem:[#allocation13 + $0x290] sm:$0xff]  ;;  %v1118_v40 = vld [vmem:[#allocation13 + $0x248] sm:$0xff]  ;;  %v1120_v41 = vld [vmem:[#allocation13 + $0x258] sm:$0xff]  ;;  %v2193_v28 = vmov 5   ;;  %v2194_v29 = vmov 6  }
 0x221   : > { %1221 = vmatprep.subr.mxu1 %v1142_v5  ;;  %1298 = vmatprep.subr.mxu0 %v1144_v30  ;;  %v1117_v42 = vld [vmem:[#allocation13 + $0x240] sm:$0xff]  ;;  %v1119_v43 = vld [vmem:[#allocation13 + $0x250] sm:$0xff]  ;;  %v1110_v44 = vld [vmem:[#allocation13 + $0x208] sm:$0xff]  ;;  %v2195_v5 = vmov 7  }
 0x222   : > { %1222 = vmatpush1.msra.mxu1 %v1141_v31  ;;  %1299 = vmatpush1.msra.mxu0 %v1143_v32  ;;  %v1112_v45 = vld [vmem:[#allocation13 + $0x218] sm:$0xff]  ;;  %v1109_v46 = vld [vmem:[#allocation13 + $0x200] sm:$0xff]  ;;  %v1111_v47 = vld [vmem:[#allocation13 + $0x210] sm:$0xff] }
 0x223   : > { %1223 = vmatprep.subr.mxu1 %v1134_v6  ;;  %1300 = vmatprep.subr.mxu0 %v1136_v33  ;;  %v1102_v48 = vld [vmem:[#allocation13 + $0x1c8] sm:$0xff]  ;;  %v1104_v49 = vld [vmem:[#allocation13 + $0x1d8] sm:$0xff]  ;;  %v1101_v50 = vld [vmem:[#allocation13 + $0x1c0] sm:$0xff] }
 0x224   : > { %1224 = vmatpush1.msra.mxu1 %v1133_v34  ;;  %1301 = vmatpush1.msra.mxu0 %v1135_v35  ;;  %v1103_v51 = vld [vmem:[#allocation13 + $0x1d0] sm:$0xff]  ;;  %v1094_v52 = vld [vmem:[#allocation13 + $0x188] sm:$0xff]  ;;  %v1096_v53 = vld [vmem:[#allocation13 + $0x198] sm:$0xff] }
 0x225   : > { %1225 = vmatprep.subr.mxu1 %v1126_v36  ;;  %1302 = vmatprep.subr.mxu0 %v1128_v37  ;;  %v1093_v54 = vld [vmem:[#allocation13 + $0x180] sm:$0xff]  ;;  %v1095_v55 = vld [vmem:[#allocation13 + $0x190] sm:$0xff]  ;;  %v1086_v56 = vld [vmem:[#allocation13 + $0x148] sm:$0xff] }
 0x226   : > { %1226 = vmatpush1.msra.mxu1 %v1125_v38  ;;  %1303 = vmatpush1.msra.mxu0 %v1127_v39  ;;  %v1088_v57 = vld [vmem:[#allocation13 + $0x158] sm:$0xff]  ;;  %v1085_v58 = vld [vmem:[#allocation13 + $0x140] sm:$0xff]  ;;  %v1087_v59 = vld [vmem:[#allocation13 + $0x150] sm:$0xff] }
 0x227   : > { %1227 = vmatprep.subr.mxu1 %v1118_v40  ;;  %1304 = vmatprep.subr.mxu0 %v1120_v41  ;;  %v1078_v60 = vld [vmem:[#allocation13 + $0x108] sm:$0xff]  ;;  %v1080_v61 = vld [vmem:[#allocation13 + $0x118] sm:$0xff]  ;;  %v1077_v62 = vld [vmem:[#allocation13 + $0x100] sm:$0xff] }
 0x228   : > { %1228 = vmatpush1.msra.mxu1 %v1117_v42  ;;  %1305 = vmatpush1.msra.mxu0 %v1119_v43  ;;  %v1079_v63 = vld [vmem:[#allocation13 + $0x110] sm:$0xff]  ;;  %v1070_v0 = vld [vmem:[#allocation13 + $0xc8] sm:$0xff]  ;;  %v1072_v1 = vld [vmem:[#allocation13 + $0xd8] sm:$0xff] }
 0x229   : > { %1229 = vmatprep.subr.mxu1 %v1110_v44  ;;  %1306 = vmatprep.subr.mxu0 %v1112_v45  ;;  %v1069_v2 = vld [vmem:[#allocation13 + $0xc0] sm:$0xff]  ;;  %v1071_v3 = vld [vmem:[#allocation13 + $0xd0] sm:$0xff]  ;;  %v1062_v4 = vld [vmem:[#allocation13 + $0x88] sm:$0xff] }
 0x22a   : > { %1230 = vmatpush1.msra.mxu1 %v1109_v46  ;;  %1307 = vmatpush1.msra.mxu0 %v1111_v47  ;;  %v1064_v9 = vld [vmem:[#allocation13 + $0x98] sm:$0xff]  ;;  %v1061_v10 = vld [vmem:[#allocation13 + $0x80] sm:$0xff]  ;;  %v1063_v11 = vld [vmem:[#allocation13 + $0x90] sm:$0xff] }
 0x22b   : > { %1231 = vmatprep.subr.mxu1 %v1102_v48  ;;  %1308 = vmatprep.subr.mxu0 %v1104_v49  ;;  %v1054_v12 = vld [vmem:[#allocation13 + $0x48] sm:$0xff]  ;;  %v1056_v13 = vld [vmem:[#allocation13 + $0x58] sm:$0xff]  ;;  %v1053_v14 = vld [vmem:[#allocation13 + $0x40] sm:$0xff] }
 0x22c   : > { %1232 = vmatpush1.msra.mxu1 %v1101_v50  ;;  %1309 = vmatpush1.msra.mxu0 %v1103_v51  ;;  %v1055_v15 = vld [vmem:[#allocation13 + $0x50] sm:$0xff]  ;;  %v1046_v16 = vld [vmem:[#allocation13 + $0x8] sm:$0xff]  ;;  %v1048_v17 = vld [vmem:[#allocation13 + $0x18] sm:$0xff] }
 0x22d   : > { %1233 = vmatprep.subr.mxu1 %v1094_v52  ;;  %1310 = vmatprep.subr.mxu0 %v1096_v53  ;;  %v1045_v18 = vld [vmem:[#allocation13] sm:$0xff]  ;;  %v1047_v19 = vld [vmem:[#allocation13 + $0x10] sm:$0xff]  ;;  %v1170_v20 = vld [vmem:[#allocation13 + $0x3e8] sm:$0xff] }
 0x22e   : > { %1234 = vmatpush1.msra.mxu1 %v1093_v54  ;;  %1311 = vmatpush1.msra.mxu0 %v1095_v55  ;;  %v1172_v21 = vld [vmem:[#allocation13 + $0x3f8] sm:$0xff]  ;;  %v1845_v31 = vld [vmem:[%s2519_s13] ss:$0 sm:$0xff]  ;;  %v1171_v36 = vld [vmem:[#allocation13 + $0x3f0] sm:$0xff] }
 0x22f   : > { %1235 = vmatprep.subr.mxu1 %v1086_v56  ;;  %1312 = vmatprep.subr.mxu0 %v1088_v57  ;;  %v1169_v35 = vld [vmem:[#allocation13 + $0x3e0] sm:$0xff]  ;;  %v1162_v38 = vld [vmem:[#allocation13 + $0x3a8] sm:$0xff]  ;;  %v1164_v39 = vld [vmem:[#allocation13 + $0x3b8] sm:$0xff] }
 0x230   : > { %1236 = vmatpush1.msra.mxu1 %v1085_v58  ;;  %1313 = vmatpush1.msra.mxu0 %v1087_v59  ;;  %v1154_v41 = vld [vmem:[#allocation13 + $0x368] sm:$0xff]  ;;  %v1156_v42 = vld [vmem:[#allocation13 + $0x378] sm:$0xff]  ;;  %v1153_v43 = vld [vmem:[#allocation13 + $0x360] sm:$0xff] }
 0x231   : > { %1237 = vmatprep.subr.mxu1 %v1078_v60  ;;  %1314 = vmatprep.subr.mxu0 %v1080_v61  ;;  %v1155_v44 = vld [vmem:[#allocation13 + $0x370] sm:$0xff]  ;;  %v1146_v46 = vld [vmem:[#allocation13 + $0x328] sm:$0xff]  ;;  %v1148_v47 = vld [vmem:[#allocation13 + $0x338] sm:$0xff] }
 0x232   : > { %1238 = vmatpush1.msra.mxu1 %v1077_v62  ;;  %1315 = vmatpush1.msra.mxu0 %v1079_v63  ;;  %v1145_v48 = vld [vmem:[#allocation13 + $0x320] sm:$0xff]  ;;  %v1147_v49 = vld [vmem:[#allocation13 + $0x330] sm:$0xff]  ;;  %v1138_v50 = vld [vmem:[#allocation13 + $0x2e8] sm:$0xff] }
 0x233   : > { %1239 = vmatprep.subr.mxu1 %v1070_v0  ;;  %1316 = vmatprep.subr.mxu0 %v1072_v1  ;;  %v1140_v51 = vld [vmem:[#allocation13 + $0x2f8] sm:$0xff]  ;;  %v1137_v52 = vld [vmem:[#allocation13 + $0x2e0] sm:$0xff]  ;;  %v1139_v53 = vld [vmem:[#allocation13 + $0x2f0] sm:$0xff] }
 0x234   : > { %1240 = vmatpush1.msra.mxu1 %v1069_v2  ;;  %1317 = vmatpush1.msra.mxu0 %v1071_v3  ;;  %v1130_v54 = vld [vmem:[#allocation13 + $0x2a8] sm:$0xff]  ;;  %v1132_v55 = vld [vmem:[#allocation13 + $0x2b8] sm:$0xff]  ;;  %v1129_v56 = vld [vmem:[#allocation13 + $0x2a0] sm:$0xff] }
 0x235   : > { %1241 = vmatprep.subr.mxu1 %v1062_v4  ;;  %1318 = vmatprep.subr.mxu0 %v1064_v9  ;;  %v1131_v57 = vld [vmem:[#allocation13 + $0x2b0] sm:$0xff]  ;;  %v1122_v58 = vld [vmem:[#allocation13 + $0x268] sm:$0xff]  ;;  %v1124_v59 = vld [vmem:[#allocation13 + $0x278] sm:$0xff] }
 0x236   : > { %1242 = vmatpush1.msra.mxu1 %v1061_v10  ;;  %1319 = vmatpush1.msra.mxu0 %v1063_v11  ;;  %v1121_v60 = vld [vmem:[#allocation13 + $0x260] sm:$0xff]  ;;  %v1123_v61 = vld [vmem:[#allocation13 + $0x270] sm:$0xff]  ;;  %v1114_v62 = vld [vmem:[#allocation13 + $0x228] sm:$0xff] }
 0x237   : > { %1243 = vmatprep.subr.mxu1 %v1054_v12  ;;  %1320 = vmatprep.subr.mxu0 %v1056_v13  ;;  %v1116_v63 = vld [vmem:[#allocation13 + $0x238] sm:$0xff]  ;;  %v1113_v0 = vld [vmem:[#allocation13 + $0x220] sm:$0xff]  ;;  %v1115_v1 = vld [vmem:[#allocation13 + $0x230] sm:$0xff] }
 0x238   : > { %1244 = vmatpush1.msra.mxu1 %v1053_v14  ;;  %1321 = vmatpush1.msra.mxu0 %v1055_v15  ;;  %v1106_v2 = vld [vmem:[#allocation13 + $0x1e8] sm:$0xff]  ;;  %v1108_v3 = vld [vmem:[#allocation13 + $0x1f8] sm:$0xff]  ;;  %v1105_v4 = vld [vmem:[#allocation13 + $0x1e0] sm:$0xff] }
 0x239   : > { %1245 = vmatprep.subr.mxu1 %v1046_v16  ;;  %1322 = vmatprep.subr.mxu0 %v1048_v17  ;;  %v1107_v9 = vld [vmem:[#allocation13 + $0x1f0] sm:$0xff]  ;;  %v1098_v10 = vld [vmem:[#allocation13 + $0x1a8] sm:$0xff]  ;;  %v1100_v11 = vld [vmem:[#allocation13 + $0x1b8] sm:$0xff] }
 0x23a   : > { %1246 = vmatpush1.msra.mxu1 %v1045_v18  ;;  %1323 = vmatpush1.msra.mxu0 %v1047_v19  ;;  %v1097_v12 = vld [vmem:[#allocation13 + $0x1a0] sm:$0xff]  ;;  %v1099_v13 = vld [vmem:[#allocation13 + $0x1b0] sm:$0xff]  ;;  %v1090_v14 = vld [vmem:[#allocation13 + $0x168] sm:$0xff] }
 0x23b   : > { %1279 = vmatprep.mubr.f32.mxu1 %v2187_v22  ;;  %1356 = vmatprep.mubr.f32.mxu0 %v2187_v22  ;;  %v1092_v15 = vld [vmem:[#allocation13 + $0x178] sm:$0xff]  ;;  %v1089_v16 = vld [vmem:[#allocation13 + $0x160] sm:$0xff]  ;;  %v1091_v17 = vld [vmem:[#allocation13 + $0x170] sm:$0xff] }
 0x23c   : > { %1369 = vmatprep.subr.mxu1 %v1170_v20  ;;  %1446 = vmatprep.subr.mxu0 %v1172_v21  ;;  %v1082_v18 = vld [vmem:[#allocation13 + $0x128] sm:$0xff]  ;;  %v1084_v19 = vld [vmem:[#allocation13 + $0x138] sm:$0xff]  ;;  %v1081_v20 = vld [vmem:[#allocation13 + $0x120] sm:$0xff] }
 0x23d   : > { %1982 = vset.pattern.permute.xlu1 %v2188_v23  ;;  %1981 = vset.pattern.permute.xlu0 %v2189_v24  ;;  %v1083_v21 = vld [vmem:[#allocation13 + $0x130] sm:$0xff]  ;;  %v1074_v23 = vld [vmem:[#allocation13 + $0xe8] sm:$0xff]  ;;  %v1076_v24 = vld [vmem:[#allocation13 + $0xf8] sm:$0xff] }
 0x23e   : > { %1536 = vperm.xlu1 %1982, %v2384_v7   ;;  %1525 = vperm.xlu0 %1981, %v2384_v7  }
 0x242   : > { %1540 = vperm.xlu1 %1982, %v2386_v8   ;;  %1530 = vperm.xlu0 %1981, %v2386_v8  }
 0x246   : > { %1984 = vset.pattern.permute.xlu1 %v2190_v25  ;;  %1983 = vset.pattern.permute.xlu0 %v2190_v25  ;;  %v1073_v25 = vld [vmem:[#allocation13 + $0xe0] sm:$0xff] }
 0x247   : > { %1552 = vperm.xlu1 %1984, %v2386_v8   ;;  %1548 = vperm.xlu0 %1983, %v2384_v7  }
 0x24b   : > { %1985 = vset.pattern.permute.xlu1 %v2191_v26  ;;  %1986 = vset.pattern.permute.xlu0 %v2191_v26  ;;  %v1075_v26 = vld [vmem:[#allocation13 + $0xf0] sm:$0xff] }
 0x24c   : > { %1560 = vperm.xlu1 %1985, %v2384_v7   ;;  %1564 = vperm.xlu0 %1986, %v2386_v8  }
 0x250   : > { %1987 = vset.pattern.permute.xlu1 %v2192_v27  ;;  %1988 = vset.pattern.permute.xlu0 %v2193_v28  ;;  %v1066_v27 = vld [vmem:[#allocation13 + $0xa8] sm:$0xff] }
 0x251   : > { %1572 = vperm.xlu1 %1987, %v2384_v7   ;;  %1584 = vperm.xlu0 %1988, %v2384_v7  }
 0x255   : > { %1576 = vperm.xlu1 %1987, %v2386_v8   ;;  %1991 = vset.pattern.permute.xlu0 %v2194_v29 }
 0x256   : > { %1600 = vperm.xlu0 %1991, %v2386_v8  }
 0x259   : > { %1989 = vset.pattern.permute.xlu1 %v2193_v28  ;;  %v1068_v28 = vld [vmem:[#allocation13 + $0xb8] sm:$0xff] }
 0x25a   : > { %1588 = vperm.xlu1 %1989, %v2386_v8   ;;  %1993 = vset.pattern.permute.xlu0 %v2195_v5 }
 0x25e   : > { %1990 = vset.pattern.permute.xlu1 %v2194_v29  ;;  %v1065_v29 = vld [vmem:[#allocation13 + $0xa0] sm:$0xff] }
 0x25f   : > { %1596 = vperm.xlu1 %1990, %v2384_v7  }
 0x263   : > { %1992 = vset.pattern.permute.xlu1 %v2195_v5  ;;  %v1067_v5 = vld [vmem:[#allocation13 + $0xb0] sm:$0xff] }
 0x264   : > { %1608 = vperm.xlu1 %1992, %v2384_v7   ;;  %v1161_v7 = vld [vmem:[#allocation13 + $0x3a0] sm:$0xff] }
 0x268   : > { %1612 = vperm.xlu1 %1992, %v2386_v8   ;;  %v1163_v8 = vld [vmem:[#allocation13 + $0x3b0] sm:$0xff] }
 0x2db   : > { %v1873_v30 = vpop.f32.mrf.mxu0 }
 0x2dc   : > { %v1036_v33 = vadd.f32 %v1873_v30, %v1845_v31  ;;  %v1058_v30 = vld [vmem:[#allocation13 + $0x68] sm:$0xff] }
 0x2dd   : > { %v1030_v32 = vpop.f32.mrf.mxu0 }
 0x2de   : > { %v1031_v6 = vadd.f32 %v1845_v31, %v1030_v32  ;;  %v1042_v40 = vmul.f32 0.01, %v1036_v33  ;;  %vm1040_vm7 = vcmp.ge.f32.partialorder %v1036_v33, 0.0  ;;  %v1060_v31 = vld [vmem:[#allocation13 + $0x78] sm:$0xff]  ;;  %v1057_v32 = vld [vmem:[#allocation13 + $0x60] sm:$0xff] }
 0x2e0   : > { %vm1039_vm6 = vcmp.ge.f32.partialorder %v1031_v6, 0.0  ;;  %v1041_v34 = vmul.f32 0.01, %v1031_v6  ;;  %v2442_v45 = vsel %vm1040_vm7, %v1036_v33, %v1042_v40  ;;  %v1050_v33 = vld [vmem:[#allocation13 + $0x28] sm:$0xff] }
 0x2e2   : > { %v2436_v37 = vsel %vm1039_vm6, %v1031_v6, %v1041_v34  ;;  %v1059_v6 = vld [vmem:[#allocation13 + $0x70] sm:$0xff]  ;;  %v1052_v34 = vld [vmem:[#allocation13 + $0x38] sm:$0xff] }
 0x2e3   : > { %1280 = vmatmul.mubr.f32.vlgmr.msra.gmra.mxu1 %v2436_v37  ;;  %1357 = vmatmul.mubr.f32.vlgmr.msra.gmra.mxu0 %v2436_v37 }
 0x2e4   : > { %1370 = vmatpush1.msra.mxu1 %v1169_v35  ;;  %1447 = vmatpush1.msra.mxu0 %v1171_v36  ;;  %v1049_v35 = vld [vmem:[#allocation13 + $0x20] sm:$0xff]  ;;  %v1051_v36 = vld [vmem:[#allocation13 + $0x30] sm:$0xff] }
 0x2e5   : > { %1371 = vmatprep.subr.mxu1 %v1162_v38  ;;  %1448 = vmatprep.subr.mxu0 %v1164_v39  ;;  %v1537_v38 = vpop.permute.xlu1 %1536 }
 0x2e6   : > { %1372 = vmatpush1.msra.mxu1 %v1161_v7  ;;  %1449 = vmatpush1.msra.mxu0 %v1163_v8  ;;  %v1175_v8 = vlaneseq }
 0x2e7   : > { %1285 = vmatprep.mubr.f32.mxu1 %v2187_v22  ;;  %1362 = vmatprep.mubr.f32.mxu0 %v2187_v22 }
 0x2e8   : > { %1373 = vmatprep.subr.mxu1 %v1154_v41  ;;  %1450 = vmatprep.subr.mxu0 %v1156_v42  ;;  %v1176_v41 = vshrl.u32 %v1175_v8, 7 }
 0x2e9   : > { %1286 = vmatmul.mubr.f32.gmra.mxu1 %v2442_v45  ;;  %1363 = vmatmul.mubr.f32.gmra.mxu0 %v2442_v45  ;;  %v1541_v39 = vpop.permute.xlu1 %1540 }
 0x2ea   : > { %1374 = vmatpush1.msra.mxu1 %v1153_v43  ;;  %1451 = vmatpush1.msra.mxu0 %v1155_v44  ;;  %v1181_v43 = vsub.s32 1, %v1176_v41 }
 0x2eb   : > { %1375 = vmatprep.subr.mxu1 %v1146_v46  ;;  %1452 = vmatprep.subr.mxu0 %v1148_v47  ;;  %v1526_v46 = vpop.permute.xlu0 %1525  ;;  %v1177_v47 = vsub.s32 0, %v1176_v41 }
 0x2ec   : > { %1376 = vmatpush1.msra.mxu1 %v1145_v48  ;;  %1453 = vmatpush1.msra.mxu0 %v1147_v49 }
 0x2ed   : > { %1377 = vmatprep.subr.mxu1 %v1138_v50  ;;  %1454 = vmatprep.subr.mxu0 %v1140_v51  ;;  %v1553_v7 = vpop.permute.xlu1 %1552 }
 0x2ee   : > { %1378 = vmatpush1.msra.mxu1 %v1137_v52  ;;  %1455 = vmatpush1.msra.mxu0 %v1139_v53 }
 0x2ef   : > { %1379 = vmatprep.subr.mxu1 %v1130_v54  ;;  %1456 = vmatprep.subr.mxu0 %v1132_v55  ;;  %v1531_v52 = vpop.permute.xlu0 %1530 }
 0x2f0   : > { %1380 = vmatpush1.msra.mxu1 %v1129_v56  ;;  %1457 = vmatpush1.msra.mxu0 %v1131_v57 }
 0x2f1   : > { %1381 = vmatprep.subr.mxu1 %v1122_v58  ;;  %1458 = vmatprep.subr.mxu0 %v1124_v59  ;;  %v1561_v42 = vpop.permute.xlu1 %1560  ;;  %v1189_v58 = vsub.s32 3, %v1176_v41 }
 0x2f2   : > { %1382 = vmatpush1.msra.mxu1 %v1121_v60  ;;  %1459 = vmatpush1.msra.mxu0 %v1123_v61 }
 0x2f3   : > { %1383 = vmatprep.subr.mxu1 %v1114_v62  ;;  %1460 = vmatprep.subr.mxu0 %v1116_v63  ;;  %v1549_v63 = vpop.permute.xlu0 %1548 }
 0x2f4   : > { %1384 = vmatpush1.msra.mxu1 %v1113_v0  ;;  %1461 = vmatpush1.msra.mxu0 %v1115_v1 }
 0x2f5   : > { %1385 = vmatprep.subr.mxu1 %v1106_v2  ;;  %1462 = vmatprep.subr.mxu0 %v1108_v3 }
 0x2f6   : > { %1386 = vmatpush1.msra.mxu1 %v1105_v4  ;;  %1463 = vmatpush1.msra.mxu0 %v1107_v9  ;;  %v1193_v9 = vsub.s32 4, %v1176_v41 }
 0x2f7   : > { %1387 = vmatprep.subr.mxu1 %v1098_v10  ;;  %1464 = vmatprep.subr.mxu0 %v1100_v11  ;;  %v1201_v11 = vsub.s32 6, %v1176_v41 }
 0x2f8   : > { %1388 = vmatpush1.msra.mxu1 %v1097_v12  ;;  %1465 = vmatpush1.msra.mxu0 %v1099_v13  ;;  %v1197_v13 = vsub.s32 5, %v1176_v41 }
 0x2f9   : > { %1389 = vmatprep.subr.mxu1 %v1090_v14  ;;  %1466 = vmatprep.subr.mxu0 %v1092_v15 }
 0x2fa   : > { %1390 = vmatpush1.msra.mxu1 %v1089_v16  ;;  %1467 = vmatpush1.msra.mxu0 %v1091_v17  ;;  %v1565_v16 = vpop.permute.xlu0 %1564  ;;  %v1205_v17 = vsub.s32 7, %v1176_v41 }
 0x2fb   : > { %1391 = vmatprep.subr.mxu1 %v1082_v18  ;;  %1468 = vmatprep.subr.mxu0 %v1084_v19 }
 0x2fc   : > { %1392 = vmatpush1.msra.mxu1 %v1081_v20  ;;  %1469 = vmatpush1.msra.mxu0 %v1083_v21 }
 0x2fd   : > { %1393 = vmatprep.subr.mxu1 %v1074_v23  ;;  %1470 = vmatprep.subr.mxu0 %v1076_v24 }
 0x2fe   : > { %1394 = vmatpush1.msra.mxu1 %v1073_v25  ;;  %1471 = vmatpush1.msra.mxu0 %v1075_v26 }
 0x2ff   : > { %1395 = vmatprep.subr.mxu1 %v1066_v27  ;;  %1472 = vmatprep.subr.mxu0 %v1068_v28 }
 0x300   : > { %1396 = vmatpush1.msra.mxu1 %v1065_v29  ;;  %1473 = vmatpush1.msra.mxu0 %v1067_v5 }
 0x301   : > { %1397 = vmatprep.subr.mxu1 %v1058_v30  ;;  %1474 = vmatprep.subr.mxu0 %v1060_v31 }
 0x302   : > { %1398 = vmatpush1.msra.mxu1 %v1057_v32  ;;  %1475 = vmatpush1.msra.mxu0 %v1059_v6 }
 0x303   : > { %1399 = vmatprep.subr.mxu1 %v1050_v33  ;;  %1476 = vmatprep.subr.mxu0 %v1052_v34  ;;  %v1585_v33 = vpop.permute.xlu0 %1584 }
 0x304   : > { %1400 = vmatpush1.msra.mxu1 %v1049_v35  ;;  %1433 = vmatprep.mubr.f32.mxu1 %v2187_v22 }
 0x305   : > { %1477 = vmatpush1.msra.mxu0 %v1051_v36  ;;  %1510 = vmatprep.mubr.f32.mxu0 %v2187_v22 }
 0x306   : > { %1434 = vmatmul.mubr.f32.vlgmr.msra.gmra.mxu1 %v2436_v37  ;;  %1511 = vmatmul.mubr.f32.vlgmr.msra.gmra.mxu0 %v2436_v37  ;;  %v1573_v37 = vpop.permute.xlu1 %1572 }
 0x307   : > { %1439 = vmatprep.mubr.f32.mxu1 %v2187_v22  ;;  %1516 = vmatprep.mubr.f32.mxu0 %v2187_v22  ;;  %v1173_v22 = vld [vmem:[%s2521_s15] sm:$0xff] }
 0x308   : > { %v1182_v48 = vrot.slane %v1173_v22, %v1181_v43  ;;  %v1178_v50 = vrot.slane %v1173_v22, %v1177_v47  ;;  %v1190_v3 = vrot.slane %v1173_v22, %v1189_v58  ;;  %v1194_v23 = vrot.slane %v1173_v22, %v1193_v9 }
 0x309   : > { %v1202_v25 = vrot.slane %v1173_v22, %v1201_v11  ;;  %v1198_v27 = vrot.slane %v1173_v22, %v1197_v13  ;;  %v1206_v31 = vrot.slane %v1173_v22, %v1205_v17 }
 0x30a   : > { %1440 = vmatmul.mubr.f32.gmra.mxu1 %v2442_v45  ;;  %1517 = vmatmul.mubr.f32.gmra.mxu0 %v2442_v45  ;;  %v1185_v45 = vsub.s32 2, %v1176_v41  ;;  %v1577_v55 = vpop.permute.xlu1 %1576 }
 0x30c   : > { %v1186_v57 = vrot.slane %v1173_v22, %v1185_v45 }
 0x30e   : > { %v1589_v62 = vpop.permute.xlu1 %1588 }
 0x312   : > { %v1597_v21 = vpop.permute.xlu1 %1596 }
 0x316   : > { %v1609_v41 = vpop.permute.xlu1 %1608 }
 0x3a3   : > { %v1281_v40 = vpop.f32.mrf.mxu1  ;;  %v1358_v51 = vpop.f32.mrf.mxu0 }
 0x3a4   : > { %v1282_v56 = vadd.f32 %v1281_v40, %v1178_v50  ;;  %v1359_v2 = vadd.f32 %v1358_v51, %v1186_v57 }
 0x3a5   : > { %v1283_v44 = vpop.f32.mrf.mxu1  ;;  %v1360_v59 = vpop.f32.mrf.mxu0 }
 0x3a6   : > { %v1284_v53 = vadd.f32 %v1283_v44, %v1182_v48  ;;  %v1533_v1 = vmul.f32 %v1526_v46, %v1282_v56  ;;  %v1555_v18 = vmul.f32 %v1549_v63, %v1359_v2  ;;  %v1361_v19 = vadd.f32 %v1360_v59, %v1190_v3 }
 0x3a8   : > { %v1543_v61 = vmul.f32 %v1537_v38, %v1284_v53  ;;  %v1567_v32 = vmul.f32 %v1561_v42, %v1361_v19 }
 0x3a9   : > { %v1287_v49 = vpop.f32.mrf.mxu1  ;;  %v1364_v4 = vpop.f32.mrf.mxu0 }
 0x3aa   : > { %v1288_v0 = vadd.f32 %v1287_v49, %v1178_v50  ;;  %v1545_v12 = vadd.f32 %v1543_v61, %v1533_v1  ;;  %v1365_v15 = vadd.f32 %v1364_v4, %v1186_v57  ;;  %v1601_v57 = vpop.permute.xlu0 %1600  ;;  %v1613_v61 = vpop.permute.xlu1 %1612 }
 0x3ab   : > { %v1289_v54 = vpop.f32.mrf.mxu1  ;;  %v1366_v20 = vpop.f32.mrf.mxu0 }
 0x3ac   : > { %v1290_v60 = vadd.f32 %v1289_v54, %v1182_v48  ;;  %v1534_v14 = vmul.f32 %v1531_v52, %v1288_v0  ;;  %v1557_v26 = vadd.f32 %v1555_v18, %v1545_v12  ;;  %v1556_v28 = vmul.f32 %v1553_v7, %v1365_v15 }
 0x3ad   : > { %v1367_v29 = vadd.f32 %v1366_v20, %v1190_v3 }
 0x3ae   : > { %v1544_v10 = vmul.f32 %v1541_v39, %v1290_v60  ;;  %v1569_v39 = vadd.f32 %v1567_v32, %v1557_v26 }
 0x3af   : > { %v1568_v43 = vmul.f32 %v1565_v16, %v1367_v29 }
 0x3b0   : > { %v1546_v24 = vadd.f32 %v1544_v10, %v1534_v14 }
 0x3b2   : > { %v1558_v34 = vadd.f32 %v1556_v28, %v1546_v24 }
 0x3b4   : > { %v1570_v50 = vadd.f32 %v1568_v43, %v1558_v34 }
 0x3c6   : > { %v1435_v5 = vpop.f32.mrf.mxu1  ;;  %v1512_v30 = vpop.f32.mrf.mxu0 }
 0x3c7   : > { %v1436_v6 = vadd.f32 %v1435_v5, %v1194_v23  ;;  %v1513_v35 = vadd.f32 %v1512_v30, %v1202_v25 }
 0x3c8   : > { %v1437_v36 = vpop.f32.mrf.mxu1  ;;  %v1514_v38 = vpop.f32.mrf.mxu0 }
 0x3c9   : > { %v1579_v8 = vmul.f32 %v1573_v37, %v1436_v6  ;;  %v1438_v40 = vadd.f32 %v1437_v36, %v1198_v27  ;;  %v1515_v44 = vadd.f32 %v1514_v38, %v1206_v31  ;;  %v1603_v22 = vmul.f32 %v1597_v21, %v1513_v35 }
 0x3ca   : > { %v1441_v46 = vpop.f32.mrf.mxu1  ;;  %v1518_v47 = vpop.f32.mrf.mxu0 }
 0x3cb   : > { %v1581_v7 = vadd.f32 %v1579_v8, %v1569_v39  ;;  %v1591_v48 = vmul.f32 %v1585_v33, %v1438_v40  ;;  %v1442_v49 = vadd.f32 %v1441_v46, %v1194_v23  ;;  %v1519_v53 = vadd.f32 %v1518_v47, %v1202_v25 }
 0x3cc   : > { %v1443_v42 = vpop.f32.mrf.mxu1  ;;  %v1520_v45 = vpop.f32.mrf.mxu0  ;;  %v1615_v56 = vmul.f32 %v1609_v41, %v1515_v44 }
 0x3cd   : > { %v1593_v51 = vadd.f32 %v1591_v48, %v1581_v7  ;;  %v1580_v52 = vmul.f32 %v1577_v55, %v1442_v49  ;;  %v1444_v54 = vadd.f32 %v1443_v42, %v1198_v27  ;;  %v1521_v60 = vadd.f32 %v1520_v45, %v1206_v31 }
 0x3ce   : > { %v1604_v0 = vmul.f32 %v1601_v57, %v1519_v53 }
 0x3cf   : > { %v1605_v37 = vadd.f32 %v1603_v22, %v1593_v51  ;;  %v1582_v58 = vadd.f32 %v1580_v52, %v1570_v50  ;;  %v1592_v59 = vmul.f32 %v1589_v62, %v1444_v54  ;;  %v1616_v3 = vmul.f32 %v1613_v61, %v1521_v60 }
 0x3d1   : > { %v1617_v63 = vadd.f32 %v1615_v56, %v1605_v37  ;;  %v1594_v1 = vadd.f32 %v1592_v59, %v1582_v58 }
 0x3d3   : > { %1619 = vst [vmem:[#allocation5] sm:$0xff] %v1617_v63  ;;  %v1606_v2 = vadd.f32 %v1604_v0, %v1594_v1 }
 0x3d5   : > { %v1618_v4 = vadd.f32 %v1616_v3, %v1606_v2 }
 0x3d7   : > { %1620 = vst [vmem:[#allocation5 + $0x8] sm:$0xff] %v1618_v4 }
 0x3d8 PF: > { %s2163_s30 = smov 0  }
 0x3d9 LB: >> { %s1628_s19 = sld [smem:[#allocation8 + %s2165_s30]]  ;;  %s1631_s24 = scalar_lea.vmem [#allocation5], %s2165_s30  ;;  %s2165_s30 = sphi %s2163_s30, %s1626_s30  }
 0x3da   : >> { %s1626_s30 = sadd.s32 1, %s2165_s30  }
 0x3db   : >> { %p1623_p0 = scmp.ge.s32.totalorder %s1626_s30, 16  }
 0x3de   : >> { %v1632_v55 = vld [vmem:[%s1631_s24] sm:$0x1] }
 0x3df   : >> { %s1629_s26 = scalar_lea.vmem [#allocation3], %s1628_s19  ;;  %1625 = sbr.rel (!%p1623_p0) target bundleno = 985 (0x3d9), region = 174 }
 0x3e0   : >> { %v1630_v62 = vld [vmem:[%s1629_s26] sm:$0x1] }
 0x3e1   : >> { %v1633_v9 = vadd.f32 %v1632_v55, %v1630_v62 }
 0x3e3   : >> { %1634 = vst [vmem:[%s1629_s26] sm:$0x1] %v1633_v9 }
 0x3e4   : > { %1636 = sbr.rel (!%p516_p8) target bundleno = 1134 (0x46e), region = 118  ;;  %v1639_v10 = vld [vmem:[%s2511_s5] sm:$0xff] (%p516_p8)  ;;  %v2196_v11 = vmov (%p516_p8), 0   ;;  %v1640_v12 = vld [vmem:[%s2511_s5 + $0x8] sm:$0xff] (%p516_p8) }
 0x3e5   : > { %1994 = vset.pattern.permute.xlu0 (%p516_p8), %v2196_v11  ;;  %v1849_v14 = vld [vmem:[%s2517_s11] ss:$0 sm:$0xff] (%p516_p8) }
 0x3e6   : > { %1643 = vperm.xlu0 (%p516_p8), %1994, %v1639_v10  }
 0x3ea   : > { %1648 = vperm.xlu0 %1994, %v1640_v12   ;;  %v1637_v13 = vld [vmem:[#allocation3] sm:$0xff]  ;;  %v1638_v17 = vld [vmem:[#allocation3 + $0x8] sm:$0xff] }
 0x461   : > { %v1644_v15 = vpop.permute.xlu0 %1643 }
 0x462   : > { %v1651_v16 = vmul.f32 %v1644_v15, %v1637_v13 }
 0x464   : > { %v1660_v18 = vadd.f32 %v1849_v14, %v1651_v16 }
 0x465   : > { %v1649_v19 = vpop.permute.xlu0 %1648 }
 0x466   : > { %vm1662_vm8 = vcmp.ge.f32.partialorder %v1660_v18, 0.0  ;;  %v1664_v20 = vmul.f32 0.01, %v1660_v18  ;;  %v1652_v21 = vmul.f32 %v1649_v19, %v1638_v17 }
 0x468   : > { %v1666_v23 = vsel %vm1662_vm8, %v1660_v18, %v1664_v20  ;;  %v1661_v24 = vadd.f32 %v1849_v14, %v1652_v21 }
 0x469   : > { %1668 = vst [vmem:[#allocation2] sm:$0xff] %v1666_v23 }
 0x46a   : > { %vm1663_vm9 = vcmp.ge.f32.partialorder %v1661_v24, 0.0  ;;  %v1665_v25 = vmul.f32 0.01, %v1661_v24 }
 0x46c   : > { %v1667_v26 = vsel %vm1663_vm9, %v1661_v24, %v1665_v25 }
 0x46d   : > { %1669 = vst [vmem:[#allocation2 + $0x8] sm:$0xff] %v1667_v26 }
 0x46e PF: > { %1673 = sbr.rel (!%p941_p7) target bundleno = 1409 (0x581), region = 122  ;;  %v1676_v27 = vld [vmem:[%s2511_s5] sm:$0xff] (%p941_p7)  ;;  %v2197_v28 = vmov (%p941_p7), 0   ;;  %v1677_v29 = vld [vmem:[%s2511_s5 + $0x8] sm:$0xff] (%p941_p7)  ;;  %s2167_s22 = smov (%p941_p7), 0  }
 0x46f   : > { %1995 = vset.pattern.permute.xlu0 (%p941_p7), %v2197_v28  ;;  %v1674_v5 = vld [vmem:[#allocation3] sm:$0xff] (%p941_p7)  ;;  %v1851_v30 = vld [vmem:[%s2522_s16] ss:$0 sm:$0xff] (%p941_p7)  ;;  %v1675_v6 = vld [vmem:[#allocation3 + $0x8] sm:$0xff] (%p941_p7) }
 0x470   : > { %1680 = vperm.xlu0 (%p941_p7), %1995, %v1676_v27  }
 0x474   : > { %1685 = vperm.xlu0 %1995, %v1677_v29  }
 0x4eb   : > { %v1681_v31 = vpop.permute.xlu0 %1680 }
 0x4ec   : > { %v1688_v32 = vmul.f32 %v1681_v31, %v1674_v5 }
 0x4ee   : > { %v1697_v33 = vadd.f32 %v1851_v30, %v1688_v32 }
 0x4ef   : > { %v1686_v34 = vpop.permute.xlu0 %1685 }
 0x4f0   : > { %vm1699_vm10 = vcmp.ge.f32.partialorder %v1697_v33, 0.0  ;;  %v1701_v35 = vmul.f32 0.01, %v1697_v33  ;;  %v1689_v36 = vmul.f32 %v1686_v34, %v1675_v6 }
 0x4f2   : > { %v1703_v38 = vsel %vm1699_vm10, %v1697_v33, %v1701_v35  ;;  %v1698_v39 = vadd.f32 %v1851_v30, %v1689_v36 }
 0x4f3   : > { %1705 = vst [vmem:[#allocation2] sm:$0xff] %v1703_v38 }
 0x4f4   : > { %vm1700_vm11 = vcmp.ge.f32.partialorder %v1698_v39, 0.0  ;;  %v1702_v8 = vmul.f32 0.01, %v1698_v39 }
 0x4f6   : > { %v1704_v40 = vsel %vm1700_vm11, %v1698_v39, %v1702_v8 }
 0x4f7   : > { %1706 = vst [vmem:[#allocation2 + $0x8] sm:$0xff] %v1704_v40 }
 0x4f8 LB: >> { %s1713_s26 = sld [smem:[#allocation9 + %s2169_s22]]  ;;  %s1716_s0 = scalar_lea.vmem [#allocation2], %s2169_s22  ;;  %s2169_s22 = sphi %s2167_s22, %s1712_s22  }
 0x4f9   : >> { %s1712_s22 = sadd.s32 1, %s2169_s22  }
 0x4fa   : >> { %p1709_p1 = scmp.ge.s32.totalorder %s1712_s22, 8  }
 0x4fb   : > { %1996 = vset.pattern.permute.xlu0 (%p1709_p1), %v2197_v28  ;;  %s2536_s3 = sld [smem:[#allocation22_spill]] (%p1709_p1) }
 0x4fe   : >> { %v1717_v41 = vld [vmem:[%s1716_s0] sm:$0x1]  ;;  %s1714_s18 = scalar_lea.vmem [#allocation15], %s1713_s26  ;;  %1711 = sbr.rel (!%p1709_p1) target bundleno = 1272 (0x4f8), region = 185 }
 0x4ff   : >> { %v1715_v43 = vld [vmem:[%s1714_s18] sm:$0x1] }
 0x500   : >> { %v1718_v44 = vadd.f32 %v1717_v41, %v1715_v43 }
 0x501   : > { %v1721_v46 = vld [vmem:[%s2536_s3] sm:$0xff] (%p1709_p1) }
 0x502   : >> { %1719 = vst [vmem:[%s1714_s18] sm:$0x1] %v1718_v44  ;;  %1724 = vperm.xlu0 (%p1709_p1), %1996, %v1721_v46  }
 0x509   : > { %v1720_v47 = vld [vmem:[#allocation15] sm:$0xff] }
 0x57d   : > { %v1725_v7 = vpop.permute.xlu0 %1724 }
 0x57e   : > { %v1727_v48 = vmul.f32 %v1725_v7, %v1720_v47 }
 0x580   : > { %1728 = vst [vmem:[#allocation15] sm:$0xff] %v1727_v48 }
 0x581 PF: > { %s2537_s20 = sadd.s32 4294967295, %s2157_s2   ;;  %s2198_s6 = smov [#allocation15]  }
 0x582   : > { %p2484_p2 = scmp.eq.s32.totalorder %s2537_s20, 1  ;;  %s1736_s28 = sshll.u32 %s2198_s6, 4  ;;  %s1737_s28 = int_to_ptr.vmem [resolvable:$true] %s1736_s28 }
 0x583   : > { %s2085_s30 = scalar_lea.vmem %s1737_s28, 128  ;;  %p2092_p10 = scmp.lt.s32.totalorder %s1737_s28, %s1737_s28 }
 0x584   : > { %p2086_p3 = scmp.ne.s32.totalorder %s1737_s28, %s2085_s30  ;;  %p2093_p12 = scmp.lt.s32.totalorder %s2085_s30, %s2085_s30 }
 0x586   : > { %p2087_p6 = pnand %p2086_p3, %p2484_p2  ;;  %p2094_p11 = por %p2093_p12, %p2092_p10 }
 0x588   : > { %p2088_p9 = pneg %p2087_p6 }
 0x58a   : > { %p2095_p8 = pnand %p2094_p11, %p2088_p9 }
 0x58c   : > { %2098 = shalt.err (!%p2095_p8)
}
 0x58d   : > { %1883 = dma.vmem_to_hbm [thread:$0]  (%p2484_p2), %s1737_s28, 128, %s2523_s17, [#allocation12]  }
 0x58e   : > { %2144 = dma.done.wait (%p2484_p2), [#allocation12], 128  }
 0x58f   : > { %2146 = vsyncadd (%p2484_p2), [#allocation12], 4294967168 }
 0x590 PF: > { %s44_s2 = sadd.s32 1, %s2157_s2   ;;  %s2539_s22 = smov %s2153_s23 }
 0x591   : > { %p41_p4 = scmp.ge.s32.totalorder %s44_s2, 4   ;;  %s2540_s23 = smov %s2542_s25 }
 0x593   :  { %43 = sbr.rel (!%p41_p4) target bundleno = 48 (0x30), region = 196 }
 0x598   :  { %1749 = vsyncpa [#allocation11], 1 }
 0x599   :  { %1751 = vsyncpa [#allocation11 + $0x1], 1 }
 0x59a   :  { %1752 = vsyncpa [#allocation14], 1 }
 0x59b   :  { %1753 = vsyncpa [#allocation12], 1 }
 0x59c   :  { %1755 = vsyncpa [#allocation12 + $0x1], 1 }

</bundles_post_ra>
